<compile_context>
chip_gen: v5e
topology: v5e:2x2
jax: 0.10.0
libtpu: 0.0.40
codegen_flags: <defaults>
</compile_context>

<pallas_src>
import jax
import jax.numpy as jnp
from jax.experimental import pallas as pl
from jax.experimental.pallas import tpu as pltpu

# ---- small synthetic config (consistent with the module's constructor shapes) ----
VOCAB = 128     # vocab_size
H = 32          # num_hiddens
S = 8           # sequence length
B = 2           # batch
HEADS = 2       # num_heads
DH = H // HEADS
FFN = 64        # ffn_num_hiddens
LAYERS = 2      # num_layers
MAXLEN = 64     # max_len for positional embedding
P = 3           # num masked prediction positions per sequence
NSP_PAD = 128   # lane-dense padding for the 2-wide NSP output
EPS = 1e-5      # PyTorch LayerNorm default eps

BF16 = jnp.bfloat16


def _layernorm(x, gamma, beta):
    # f32 elementwise math (VPU); gamma/beta are (1, features)
    mu = jnp.mean(x, axis=-1, keepdims=True)
    var = jnp.mean((x - mu) ** 2, axis=-1, keepdims=True)
    return (x - mu) * jax.lax.rsqrt(var + EPS) * gamma + beta


# ----------------------------- Pallas kernels --------------------------------

def encoder_stack_kernel(x_ref,
                         wqkv_ref, bqkv_ref, wo_ref, bo_ref, g1_ref, be1_ref,
                         w1_ref, b1_ref, w2_ref, b2_ref, g2_ref, be2_ref,
                         out_ref):
    """One grid step == one batch element; all LAYERS encoder blocks run as a static
    in-kernel loop with the full stacked weights resident in VMEM."""
    x = x_ref[...]                                   # (S, H) f32
    scale = 1.0 / jnp.sqrt(jnp.float32(DH))

    # TODO(synk): valid_lens attention masking not implemented (valid_lens=None path).
    for l in range(LAYERS):                          # static unroll; no grid-step overhead
        xb = x.astype(BF16)                          # bf16 MXU operands, f32 accumulation

        # Fused Q|K|V projection: one (S,H)@(H,3H) matmul + one bias add.
        qkv = jnp.dot(xb, wqkv_ref[l], preferred_element_type=jnp.float32) + bqkv_ref[l]
        q = qkv[:, 0 * H:1 * H]
        k = qkv[:, 1 * H:2 * H]
        v = qkv[:, 2 * H:3 * H]

        head_outs = []
        for h in range(HEADS):                       # static unroll, HEADS=2
            lo = h * DH
            qh = q[:, lo:lo + DH].astype(BF16)       # (S, DH)
            kh = k[:, lo:lo + DH].astype(BF16)
            vh = v[:, lo:lo + DH].astype(BF16)
            # contract last dims of both operands: no explicit .T / XLU transpose
            s = jnp.einsum('qd,kd->qk', qh, kh,
                           preferred_element_type=jnp.float32) * scale     # (S, S) f32
            s = s - jnp.max(s, axis=-1, keepdims=True)
            p = jnp.exp(s)
            # divide -> EUP reciprocal (frees the VALU slot)
            p = p * pl.reciprocal(jnp.sum(p, axis=-1, keepdims=True), approx=True)
            head_outs.append(jnp.dot(p.astype(BF16), vh,
                                     preferred_element_type=jnp.float32))  # (S, DH)

        # concat heads, then ONE full-width output projection
        cat = jnp.concatenate(head_outs, axis=-1)                          # (S, H) f32
        attn = jnp.dot(cat.astype(BF16), wo_ref[l],
                       preferred_element_type=jnp.float32) + bo_ref[l]

        # AddNorm 1 (f32)
        y = _layernorm(x + attn, g1_ref[l], be1_ref[l])

        # Position-wise FFN (bf16 MXU, f32 accumulate)
        f = jnp.dot(y.astype(BF16), w1_ref[l],
                    preferred_element_type=jnp.float32) + b1_ref[l]
        f = jnp.maximum(f, 0.0)
        z = jnp.dot(f.astype(BF16), w2_ref[l],
                    preferred_element_type=jnp.float32) + b2_ref[l]

        # AddNorm 2 -> activation for the next layer (stays a value, no HBM traffic)
        x = _layernorm(y + z, g2_ref[l], be2_ref[l])

    out_ref[...] = x                                 # single writeback per batch element


def heads_kernel(rows_ref, enc_ref,
                 mw1_ref, mb1_ref, mg_ref, mbe_ref, mw2_ref, mb2_ref,
                 hw_ref, hb_ref, nw_ref, nb_ref,
                 mlm_out_ref, nsp_out_ref):
    """Fused MaskLM head (Linear->ReLU->LayerNorm->Linear(vocab)) and
    hidden(Linear+Tanh)->NextSentencePred head in a single launch.
    The masked-position gather and CLS slice are done in-kernel:
    rows_ref holds flat row indices in SMEM, enc_ref is the (B*S, H) encoder output."""
    # --- gather masked rows via dynamic sublane reads from VMEM ---
    xm = jnp.concatenate(
        [enc_ref[pl.ds(rows_ref[i], 1), :] for i in range(B * P)], axis=0)   # (B*P, H)

    h = jnp.dot(xm.astype(BF16), mw1_ref[...],
                preferred_element_type=jnp.float32) + mb1_ref[...]
    h = jnp.maximum(h, 0.0)
    h = _layernorm(h, mg_ref[...], mbe_ref[...])
    mlm_out_ref[...] = jnp.dot(h.astype(BF16), mw2_ref[...],
                               preferred_element_type=jnp.float32) + mb2_ref[...]

    # --- CLS tokens (static row offsets b*S), hidden Linear+Tanh, NSP Linear ---
    cls = jnp.concatenate(
        [enc_ref[pl.ds(b * S, 1), :] for b in range(B)], axis=0)             # (B, H)
    hid = jnp.tanh(jnp.dot(cls.astype(BF16), hw_ref[...],
                           preferred_element_type=jnp.float32) + hb_ref[...])
    # NSP weight is zero-padded to 128 lanes -> unmasked full-lane store
    nsp_out_ref[...] = jnp.dot(hid.astype(BF16), nw_ref[...],
                               preferred_element_type=jnp.float32) + nb_ref[...]


# ------------------------------ wrappers --------------------------------------

def encoder_stack(x_emb, stk):
    """x_emb: (B, S, H) f32 embedded input. Runs all LAYERS encoder blocks in one
    pallas_call with a batch-parallel grid."""
    weight_args = (stk['wqkv'], stk['bqkv'], stk['wo'], stk['bo'], stk['g1'], stk['be1'],
                   stk['w1'], stk['b1'], stk['w2'], stk['b2'], stk['g2'], stk['be2'])

    # Activation: one (S, H) slice per batch element (leading dim squeezed).
    in_specs = [pl.BlockSpec((None, S, H), lambda b: (b, 0, 0))]
    # Weights: full stacked arrays, constant block index -> DMA'd into VMEM once.
    in_specs += [pl.BlockSpec(w.shape, lambda b: (0, 0, 0)) for w in weight_args]

    return pl.pallas_call(
        encoder_stack_kernel,
        out_shape=jax.ShapeDtypeStruct((B, S, H), jnp.float32),
        grid=(B,),
        in_specs=in_specs,
        out_specs=pl.BlockSpec((None, S, H), lambda b: (b, 0, 0)),
        compiler_params=pltpu.CompilerParams(dimension_semantics=("parallel",)),
    )(x_emb, *weight_args)


def bert_forward(params, tokens, segments, pred_positions):
    # --- BERTEncoder embeddings (plain JAX glue: tiny table lookups) ---
    X = params['tok_emb'][tokens] + params['seg_emb'][segments]
    X = X + params['pos_emb'][:, :tokens.shape[1], :]
    X = X.astype(jnp.float32)                                            # (B, S, H)

    encoded_X = encoder_stack(X, params['stack'])                        # (B, S, H)
    encoded_flat = encoded_X.reshape(B * S, H)

    # flat row indices for the masked-position gather (done inside the heads kernel)
    row_idx = (jnp.arange(B, dtype=jnp.int32)[:, None] * S
               + pred_positions.astype(jnp.int32)).reshape(-1)           # (B*P,)

    # --- fused MLM + NSP heads (single launch, gather fused via SMEM indices) ---
    m = params['mlm']
    mlm_logits, nsp_pad = pl.pallas_call(
        heads_kernel,
        out_shape=(jax.ShapeDtypeStruct((B * P, VOCAB), jnp.float32),
                   jax.ShapeDtypeStruct((B, NSP_PAD), jnp.float32)),
        in_specs=[pl.BlockSpec(memory_space=pltpu.MemorySpace.SMEM)]
                 + [pl.BlockSpec(memory_space=pltpu.MemorySpace.VMEM)] * 11,
        out_specs=(pl.BlockSpec(memory_space=pltpu.MemorySpace.VMEM),
                   pl.BlockSpec(memory_space=pltpu.MemorySpace.VMEM)),
    )(row_idx, encoded_flat,
      m['w1'], m['b1'], m['g'], m['be'], m['w2'], m['b2'],
      params['hid_w'], params['hid_b'], params['nsp_w'], params['nsp_b'])

    mlm_Y_hat = mlm_logits.reshape(B, P, VOCAB)
    nsp_Y_hat = nsp_pad[:, :2]                       # drop lane padding
    return encoded_X, mlm_Y_hat, nsp_Y_hat


# --------------------------- deterministic params -----------------------------

def init_params(key):
    keys = iter(jax.random.split(key, 64))

    def nrm(shape, scale=0.02, dtype=jnp.float32):
        return (scale * jax.random.normal(next(keys), shape, jnp.float32)).astype(dtype)

    params = {
        'tok_emb': nrm((VOCAB, H), 1.0),
        'seg_emb': nrm((2, H), 1.0),
        'pos_emb': nrm((1, MAXLEN, H), 1.0),
    }
    # Per-layer weights stacked on a leading LAYERS axis; Q/K/V fused along the lane dim.
    # Matmul weights in bf16, biases / LayerNorm params in f32.
    params['stack'] = dict(
        wqkv=nrm((LAYERS, H, 3 * H), dtype=BF16),
        bqkv=jnp.zeros((LAYERS, 1, 3 * H), jnp.float32),
        wo=nrm((LAYERS, H, H), dtype=BF16), bo=jnp.zeros((LAYERS, 1, H), jnp.float32),
        g1=jnp.ones((LAYERS, 1, H), jnp.float32), be1=jnp.zeros((LAYERS, 1, H), jnp.float32),
        w1=nrm((LAYERS, H, FFN), dtype=BF16), b1=jnp.zeros((LAYERS, 1, FFN), jnp.float32),
        w2=nrm((LAYERS, FFN, H), dtype=BF16), b2=jnp.zeros((LAYERS, 1, H), jnp.float32),
        g2=jnp.ones((LAYERS, 1, H), jnp.float32), be2=jnp.zeros((LAYERS, 1, H), jnp.float32),
    )
    params['mlm'] = dict(
        w1=nrm((H, H), dtype=BF16), b1=jnp.zeros((1, H), jnp.float32),
        g=jnp.ones((1, H), jnp.float32), be=jnp.zeros((1, H), jnp.float32),
        w2=nrm((H, VOCAB), dtype=BF16), b2=jnp.zeros((1, VOCAB), jnp.float32),
    )
    params['hid_w'] = nrm((H, H), dtype=BF16)
    params['hid_b'] = jnp.zeros((1, H), jnp.float32)
    # NSP weight zero-padded from 2 -> NSP_PAD lanes for an unmasked (lane-dense) store.
    nsp_w = jnp.zeros((H, NSP_PAD), jnp.float32).at[:, :2].set(nrm((H, 2)))
    params['nsp_w'] = nsp_w.astype(BF16)
    params['nsp_b'] = jnp.zeros((1, NSP_PAD), jnp.float32)
    return params


if __name__ == "__main__":
    key = jax.random.PRNGKey(0)
    pkey, tkey = jax.random.split(key)
    params = init_params(pkey)

    tokens = jax.random.randint(tkey, (B, S), 0, VOCAB, dtype=jnp.int32)
    segments = jnp.array([[0, 0, 0, 0, 1, 1, 1, 1],
                          [0, 0, 0, 1, 1, 1, 1, 1]], dtype=jnp.int32)
    mlm_positions = jnp.array([[1, 5, 2], [6, 1, 5]], dtype=jnp.int32)

    encoded_X, mlm_Y_hat, nsp_Y_hat = bert_forward(params, tokens, segments, mlm_positions)
    jax.block_until_ready((encoded_X, mlm_Y_hat, nsp_Y_hat))

    assert encoded_X.shape == (B, S, H)
    assert mlm_Y_hat.shape == (B, P, VOCAB)
    assert nsp_Y_hat.shape == (B, 2)
    print("KERNEL_OK")
</pallas_src>

<mosaic_0001>
module attributes {stable_mosaic.version = 11 : i64} {
  func.func @encoder_stack_kernel(%arg0: i32, %arg1: memref<1x8x32xf32, #tpu.memory_space<vmem>>, %arg2: memref<2x32x96xbf16, #tpu.memory_space<vmem>>, %arg3: memref<2x1x96xf32, #tpu.memory_space<vmem>>, %arg4: memref<2x32x32xbf16, #tpu.memory_space<vmem>>, %arg5: memref<2x1x32xf32, #tpu.memory_space<vmem>>, %arg6: memref<2x1x32xf32, #tpu.memory_space<vmem>>, %arg7: memref<2x1x32xf32, #tpu.memory_space<vmem>>, %arg8: memref<2x32x64xbf16, #tpu.memory_space<vmem>>, %arg9: memref<2x1x64xf32, #tpu.memory_space<vmem>>, %arg10: memref<2x64x32xbf16, #tpu.memory_space<vmem>>, %arg11: memref<2x1x32xf32, #tpu.memory_space<vmem>>, %arg12: memref<2x1x32xf32, #tpu.memory_space<vmem>>, %arg13: memref<2x1x32xf32, #tpu.memory_space<vmem>>, %arg14: memref<1x8x32xf32, #tpu.memory_space<vmem>>) attributes {dimension_semantics = [#tpu.dimension_semantics<parallel>], iteration_bounds = array<i64: 2>, scalar_prefetch = 0 : i64, scratch_operands = 0 : i64, tpu.core_type = #tpu.core_type<tc>, window_params = [{transform_indices = @transform_0, window_bounds = array<i64: 1, 8, 32>}, {pipeline_mode = #tpu.pipeline_mode<synchronous>, transform_indices = @transform_1, window_bounds = array<i64: 2, 32, 96>}, {pipeline_mode = #tpu.pipeline_mode<synchronous>, transform_indices = @transform_2, window_bounds = array<i64: 2, 1, 96>}, {pipeline_mode = #tpu.pipeline_mode<synchronous>, transform_indices = @transform_3, window_bounds = array<i64: 2, 32, 32>}, {pipeline_mode = #tpu.pipeline_mode<synchronous>, transform_indices = @transform_4, window_bounds = array<i64: 2, 1, 32>}, {pipeline_mode = #tpu.pipeline_mode<synchronous>, transform_indices = @transform_5, window_bounds = array<i64: 2, 1, 32>}, {pipeline_mode = #tpu.pipeline_mode<synchronous>, transform_indices = @transform_6, window_bounds = array<i64: 2, 1, 32>}, {pipeline_mode = #tpu.pipeline_mode<synchronous>, transform_indices = @transform_7, window_bounds = array<i64: 2, 32, 64>}, {pipeline_mode = #tpu.pipeline_mode<synchronous>, transform_indices = @transform_8, window_bounds = array<i64: 2, 1, 64>}, {pipeline_mode = #tpu.pipeline_mode<synchronous>, transform_indices = @transform_9, window_bounds = array<i64: 2, 64, 32>}, {pipeline_mode = #tpu.pipeline_mode<synchronous>, transform_indices = @transform_10, window_bounds = array<i64: 2, 1, 32>}, {pipeline_mode = #tpu.pipeline_mode<synchronous>, transform_indices = @transform_11, window_bounds = array<i64: 2, 1, 32>}, {pipeline_mode = #tpu.pipeline_mode<synchronous>, transform_indices = @transform_12, window_bounds = array<i64: 2, 1, 32>}, {transform_indices = @transform_13, window_bounds = array<i64: 1, 8, 32>}]} {
    %c0 = arith.constant 0 : index
    %c0_0 = arith.constant 0 : index
    %c0_1 = arith.constant 0 : index
    %0 = vector.load %arg1[%c0, %c0_0, %c0_1] : memref<1x8x32xf32, #tpu.memory_space<vmem>>, vector<1x8x32xf32>
    %1 = vector.shape_cast %0 : vector<1x8x32xf32> to vector<8x32xf32>
    %cst = arith.constant 1.600000e+01 : f32
    %2 = math.sqrt %cst : f32
    %cst_2 = arith.constant 1.000000e+00 : f32
    %3 = arith.divf %cst_2, %2 : f32
    %4 = arith.truncf %1 : vector<8x32xf32> to vector<8x32xbf16>
    %c0_3 = arith.constant 0 : index
    %c0_4 = arith.constant 0 : index
    %c0_5 = arith.constant 0 : index
    %5 = vector.load %arg2[%c0_3, %c0_4, %c0_5] : memref<2x32x96xbf16, #tpu.memory_space<vmem>>, vector<1x32x96xbf16>
    %6 = vector.shape_cast %5 : vector<1x32x96xbf16> to vector<32x96xbf16>
    %cst_6 = arith.constant dense<0.000000e+00> : vector<8x96xf32>
    %7 = tpu.matmul %4, %6, %cst_6 {dimension_numbers = #tpu.dot_dimension_numbers<[1], [0], [0], [1], [0, 0, 1, 1], [], []>} : vector<8x32xbf16>, vector<32x96xbf16>, vector<8x96xf32> -> vector<8x96xf32>
    %c0_7 = arith.constant 0 : index
    %c0_8 = arith.constant 0 : index
    %c0_9 = arith.constant 0 : index
    %8 = vector.load %arg3[%c0_7, %c0_8, %c0_9] : memref<2x1x96xf32, #tpu.memory_space<vmem>>, vector<1x1x96xf32>
    %9 = vector.shape_cast %8 : vector<1x1x96xf32> to vector<1x96xf32>
    %10 = vector.broadcast %9 : vector<1x96xf32> to vector<8x96xf32>
    %11 = arith.addf %7, %10 : vector<8x96xf32>
    %12 = vector.extract_strided_slice %11 {offsets = [0, 0], sizes = [8, 32], strides = [1, 1]} : vector<8x96xf32> to vector<8x32xf32>
    %13 = vector.extract_strided_slice %11 {offsets = [0, 32], sizes = [8, 32], strides = [1, 1]} : vector<8x96xf32> to vector<8x32xf32>
    %14 = vector.extract_strided_slice %11 {offsets = [0, 64], sizes = [8, 32], strides = [1, 1]} : vector<8x96xf32> to vector<8x32xf32>
    %15 = vector.extract_strided_slice %12 {offsets = [0, 0], sizes = [8, 16], strides = [1, 1]} : vector<8x32xf32> to vector<8x16xf32>
    %16 = arith.truncf %15 : vector<8x16xf32> to vector<8x16xbf16>
    %17 = vector.extract_strided_slice %13 {offsets = [0, 0], sizes = [8, 16], strides = [1, 1]} : vector<8x32xf32> to vector<8x16xf32>
    %18 = arith.truncf %17 : vector<8x16xf32> to vector<8x16xbf16>
    %19 = vector.extract_strided_slice %14 {offsets = [0, 0], sizes = [8, 16], strides = [1, 1]} : vector<8x32xf32> to vector<8x16xf32>
    %20 = arith.truncf %19 : vector<8x16xf32> to vector<8x16xbf16>
    "tpu.trace_start"() <{level = 10 : i32, message = "qd,kd->qk"}> : () -> ()
    %cst_10 = arith.constant dense<0.000000e+00> : vector<8x8xf32>
    %21 = tpu.matmul %16, %18, %cst_10 {dimension_numbers = #tpu.dot_dimension_numbers<[1], [1], [0], [0], [0, 0, 1, 0], [], []>} : vector<8x16xbf16>, vector<8x16xbf16>, vector<8x8xf32> -> vector<8x8xf32>
    "tpu.trace_stop"() : () -> ()
    %22 = vector.broadcast %3 : f32 to vector<8x8xf32>
    %23 = arith.mulf %21, %22 : vector<8x8xf32>
    %cst_11 = arith.constant dense<0xFF800000> : vector<8xf32>
    %24 = vector.multi_reduction <maximumf>, %23, %cst_11 [1] : vector<8x8xf32> to vector<8xf32>
    %25 = vector.shape_cast %24 : vector<8xf32> to vector<8x1xf32>
    %26 = vector.broadcast %25 : vector<8x1xf32> to vector<8x8xf32>
    %27 = arith.subf %23, %26 : vector<8x8xf32>
    %28 = math.exp %27 : vector<8x8xf32>
    %cst_12 = arith.constant dense<0.000000e+00> : vector<8xf32>
    %29 = vector.multi_reduction <add>, %28, %cst_12 [1] : vector<8x8xf32> to vector<8xf32>
    %30 = vector.shape_cast %29 : vector<8xf32> to vector<8x1xf32>
    %31 = tpu.reciprocal %30 {approx = true} : vector<8x1xf32> -> vector<8x1xf32>
    %32 = vector.broadcast %31 : vector<8x1xf32> to vector<8x8xf32>
    %33 = arith.mulf %28, %32 : vector<8x8xf32>
    %34 = arith.truncf %33 : vector<8x8xf32> to vector<8x8xbf16>
    %cst_13 = arith.constant dense<0.000000e+00> : vector<8x16xf32>
    %35 = tpu.matmul %34, %20, %cst_13 {dimension_numbers = #tpu.dot_dimension_numbers<[1], [0], [0], [1], [0, 0, 1, 1], [], []>} : vector<8x8xbf16>, vector<8x16xbf16>, vector<8x16xf32> -> vector<8x16xf32>
    %36 = vector.extract_strided_slice %12 {offsets = [0, 16], sizes = [8, 16], strides = [1, 1]} : vector<8x32xf32> to vector<8x16xf32>
    %37 = arith.truncf %36 : vector<8x16xf32> to vector<8x16xbf16>
    %38 = vector.extract_strided_slice %13 {offsets = [0, 16], sizes = [8, 16], strides = [1, 1]} : vector<8x32xf32> to vector<8x16xf32>
    %39 = arith.truncf %38 : vector<8x16xf32> to vector<8x16xbf16>
    %40 = vector.extract_strided_slice %14 {offsets = [0, 16], sizes = [8, 16], strides = [1, 1]} : vector<8x32xf32> to vector<8x16xf32>
    %41 = arith.truncf %40 : vector<8x16xf32> to vector<8x16xbf16>
    "tpu.trace_start"() <{level = 10 : i32, message = "qd,kd->qk"}> : () -> ()
    %cst_14 = arith.constant dense<0.000000e+00> : vector<8x8xf32>
    %42 = tpu.matmul %37, %39, %cst_14 {dimension_numbers = #tpu.dot_dimension_numbers<[1], [1], [0], [0], [0, 0, 1, 0], [], []>} : vector<8x16xbf16>, vector<8x16xbf16>, vector<8x8xf32> -> vector<8x8xf32>
    "tpu.trace_stop"() : () -> ()
    %43 = vector.broadcast %3 : f32 to vector<8x8xf32>
    %44 = arith.mulf %42, %43 : vector<8x8xf32>
    %cst_15 = arith.constant dense<0xFF800000> : vector<8xf32>
    %45 = vector.multi_reduction <maximumf>, %44, %cst_15 [1] : vector<8x8xf32> to vector<8xf32>
    %46 = vector.shape_cast %45 : vector<8xf32> to vector<8x1xf32>
    %47 = vector.broadcast %46 : vector<8x1xf32> to vector<8x8xf32>
    %48 = arith.subf %44, %47 : vector<8x8xf32>
    %49 = math.exp %48 : vector<8x8xf32>
    %cst_16 = arith.constant dense<0.000000e+00> : vector<8xf32>
    %50 = vector.multi_reduction <add>, %49, %cst_16 [1] : vector<8x8xf32> to vector<8xf32>
    %51 = vector.shape_cast %50 : vector<8xf32> to vector<8x1xf32>
    %52 = tpu.reciprocal %51 {approx = true} : vector<8x1xf32> -> vector<8x1xf32>
    %53 = vector.broadcast %52 : vector<8x1xf32> to vector<8x8xf32>
    %54 = arith.mulf %49, %53 : vector<8x8xf32>
    %55 = arith.truncf %54 : vector<8x8xf32> to vector<8x8xbf16>
    %cst_17 = arith.constant dense<0.000000e+00> : vector<8x16xf32>
    %56 = tpu.matmul %55, %41, %cst_17 {dimension_numbers = #tpu.dot_dimension_numbers<[1], [0], [0], [1], [0, 0, 1, 1], [], []>} : vector<8x8xbf16>, vector<8x16xbf16>, vector<8x16xf32> -> vector<8x16xf32>
    %57 = tpu.concatenate %35, %56 in 1 : vector<8x16xf32>, vector<8x16xf32> -> vector<8x32xf32>
    %58 = arith.truncf %57 : vector<8x32xf32> to vector<8x32xbf16>
    %c0_18 = arith.constant 0 : index
    %c0_19 = arith.constant 0 : index
    %c0_20 = arith.constant 0 : index
    %59 = vector.load %arg4[%c0_18, %c0_19, %c0_20] : memref<2x32x32xbf16, #tpu.memory_space<vmem>>, vector<1x32x32xbf16>
    %60 = vector.shape_cast %59 : vector<1x32x32xbf16> to vector<32x32xbf16>
    %cst_21 = arith.constant dense<0.000000e+00> : vector<8x32xf32>
    %61 = tpu.matmul %58, %60, %cst_21 {dimension_numbers = #tpu.dot_dimension_numbers<[1], [0], [0], [1], [0, 0, 1, 1], [], []>} : vector<8x32xbf16>, vector<32x32xbf16>, vector<8x32xf32> -> vector<8x32xf32>
    %c0_22 = arith.constant 0 : index
    %c0_23 = arith.constant 0 : index
    %c0_24 = arith.constant 0 : index
    %62 = vector.load %arg5[%c0_22, %c0_23, %c0_24] : memref<2x1x32xf32, #tpu.memory_space<vmem>>, vector<1x1x32xf32>
    %63 = vector.shape_cast %62 : vector<1x1x32xf32> to vector<1x32xf32>
    %64 = vector.broadcast %63 : vector<1x32xf32> to vector<8x32xf32>
    %65 = arith.addf %61, %64 : vector<8x32xf32>
    %66 = arith.addf %1, %65 : vector<8x32xf32>
    %c0_25 = arith.constant 0 : index
    %c0_26 = arith.constant 0 : index
    %c0_27 = arith.constant 0 : index
    %67 = vector.load %arg6[%c0_25, %c0_26, %c0_27] : memref<2x1x32xf32, #tpu.memory_space<vmem>>, vector<1x1x32xf32>
    %68 = vector.shape_cast %67 : vector<1x1x32xf32> to vector<1x32xf32>
    %c0_28 = arith.constant 0 : index
    %c0_29 = arith.constant 0 : index
    %c0_30 = arith.constant 0 : index
    %69 = vector.load %arg7[%c0_28, %c0_29, %c0_30] : memref<2x1x32xf32, #tpu.memory_space<vmem>>, vector<1x1x32xf32>
    %70 = vector.shape_cast %69 : vector<1x1x32xf32> to vector<1x32xf32>
    %cst_31 = arith.constant dense<0.000000e+00> : vector<8xf32>
    %71 = vector.multi_reduction <add>, %66, %cst_31 [1] : vector<8x32xf32> to vector<8xf32>
    %72 = vector.shape_cast %71 : vector<8xf32> to vector<8x1xf32>
    %cst_32 = arith.constant 3.200000e+01 : f32
    %73 = vector.broadcast %cst_32 : f32 to vector<8x1xf32>
    %74 = arith.divf %72, %73 : vector<8x1xf32>
    %75 = vector.broadcast %74 : vector<8x1xf32> to vector<8x32xf32>
    %76 = arith.subf %66, %75 : vector<8x32xf32>
    %77 = arith.mulf %76, %76 : vector<8x32xf32>
    %cst_33 = arith.constant dense<0.000000e+00> : vector<8xf32>
    %78 = vector.multi_reduction <add>, %77, %cst_33 [1] : vector<8x32xf32> to vector<8xf32>
    %79 = vector.shape_cast %78 : vector<8xf32> to vector<8x1xf32>
    %cst_34 = arith.constant 3.200000e+01 : f32
    %80 = vector.broadcast %cst_34 : f32 to vector<8x1xf32>
    %81 = arith.divf %79, %80 : vector<8x1xf32>
    %82 = vector.broadcast %74 : vector<8x1xf32> to vector<8x32xf32>
    %83 = arith.subf %66, %82 : vector<8x32xf32>
    %cst_35 = arith.constant 9.99999974E-6 : f32
    %84 = vector.broadcast %cst_35 : f32 to vector<8x1xf32>
    %85 = arith.addf %81, %84 : vector<8x1xf32>
    %86 = math.rsqrt %85 : vector<8x1xf32>
    %87 = vector.broadcast %86 : vector<8x1xf32> to vector<8x32xf32>
    %88 = arith.mulf %83, %87 : vector<8x32xf32>
    %89 = vector.broadcast %68 : vector<1x32xf32> to vector<8x32xf32>
    %90 = arith.mulf %88, %89 : vector<8x32xf32>
    %91 = vector.broadcast %70 : vector<1x32xf32> to vector<8x32xf32>
    %92 = arith.addf %90, %91 : vector<8x32xf32>
    %93 = arith.truncf %92 : vector<8x32xf32> to vector<8x32xbf16>
    %c0_36 = arith.constant 0 : index
    %c0_37 = arith.constant 0 : index
    %c0_38 = arith.constant 0 : index
    %94 = vector.load %arg8[%c0_36, %c0_37, %c0_38] : memref<2x32x64xbf16, #tpu.memory_space<vmem>>, vector<1x32x64xbf16>
    %95 = vector.shape_cast %94 : vector<1x32x64xbf16> to vector<32x64xbf16>
    %cst_39 = arith.constant dense<0.000000e+00> : vector<8x64xf32>
    %96 = tpu.matmul %93, %95, %cst_39 {dimension_numbers = #tpu.dot_dimension_numbers<[1], [0], [0], [1], [0, 0, 1, 1], [], []>} : vector<8x32xbf16>, vector<32x64xbf16>, vector<8x64xf32> -> vector<8x64xf32>
    %c0_40 = arith.constant 0 : index
    %c0_41 = arith.constant 0 : index
    %c0_42 = arith.constant 0 : index
    %97 = vector.load %arg9[%c0_40, %c0_41, %c0_42] : memref<2x1x64xf32, #tpu.memory_space<vmem>>, vector<1x1x64xf32>
    %98 = vector.shape_cast %97 : vector<1x1x64xf32> to vector<1x64xf32>
    %99 = vector.broadcast %98 : vector<1x64xf32> to vector<8x64xf32>
    %100 = arith.addf %96, %99 : vector<8x64xf32>
    %cst_43 = arith.constant 0.000000e+00 : f32
    %101 = vector.broadcast %cst_43 : f32 to vector<8x64xf32>
    %102 = arith.maximumf %100, %101 : vector<8x64xf32>
    %103 = arith.truncf %102 : vector<8x64xf32> to vector<8x64xbf16>
    %c0_44 = arith.constant 0 : index
    %c0_45 = arith.constant 0 : index
    %c0_46 = arith.constant 0 : index
    %104 = vector.load %arg10[%c0_44, %c0_45, %c0_46] : memref<2x64x32xbf16, #tpu.memory_space<vmem>>, vector<1x64x32xbf16>
    %105 = vector.shape_cast %104 : vector<1x64x32xbf16> to vector<64x32xbf16>
    %cst_47 = arith.constant dense<0.000000e+00> : vector<8x32xf32>
    %106 = tpu.matmul %103, %105, %cst_47 {dimension_numbers = #tpu.dot_dimension_numbers<[1], [0], [0], [1], [0, 0, 1, 1], [], []>} : vector<8x64xbf16>, vector<64x32xbf16>, vector<8x32xf32> -> vector<8x32xf32>
    %c0_48 = arith.constant 0 : index
    %c0_49 = arith.constant 0 : index
    %c0_50 = arith.constant 0 : index
    %107 = vector.load %arg11[%c0_48, %c0_49, %c0_50] : memref<2x1x32xf32, #tpu.memory_space<vmem>>, vector<1x1x32xf32>
    %108 = vector.shape_cast %107 : vector<1x1x32xf32> to vector<1x32xf32>
    %109 = vector.broadcast %108 : vector<1x32xf32> to vector<8x32xf32>
    %110 = arith.addf %106, %109 : vector<8x32xf32>
    %111 = arith.addf %92, %110 : vector<8x32xf32>
    %c0_51 = arith.constant 0 : index
    %c0_52 = arith.constant 0 : index
    %c0_53 = arith.constant 0 : index
    %112 = vector.load %arg12[%c0_51, %c0_52, %c0_53] : memref<2x1x32xf32, #tpu.memory_space<vmem>>, vector<1x1x32xf32>
    %113 = vector.shape_cast %112 : vector<1x1x32xf32> to vector<1x32xf32>
    %c0_54 = arith.constant 0 : index
    %c0_55 = arith.constant 0 : index
    %c0_56 = arith.constant 0 : index
    %114 = vector.load %arg13[%c0_54, %c0_55, %c0_56] : memref<2x1x32xf32, #tpu.memory_space<vmem>>, vector<1x1x32xf32>
    %115 = vector.shape_cast %114 : vector<1x1x32xf32> to vector<1x32xf32>
    %cst_57 = arith.constant dense<0.000000e+00> : vector<8xf32>
    %116 = vector.multi_reduction <add>, %111, %cst_57 [1] : vector<8x32xf32> to vector<8xf32>
    %117 = vector.shape_cast %116 : vector<8xf32> to vector<8x1xf32>
    %cst_58 = arith.constant 3.200000e+01 : f32
    %118 = vector.broadcast %cst_58 : f32 to vector<8x1xf32>
    %119 = arith.divf %117, %118 : vector<8x1xf32>
    %120 = vector.broadcast %119 : vector<8x1xf32> to vector<8x32xf32>
    %121 = arith.subf %111, %120 : vector<8x32xf32>
    %122 = arith.mulf %121, %121 : vector<8x32xf32>
    %cst_59 = arith.constant dense<0.000000e+00> : vector<8xf32>
    %123 = vector.multi_reduction <add>, %122, %cst_59 [1] : vector<8x32xf32> to vector<8xf32>
    %124 = vector.shape_cast %123 : vector<8xf32> to vector<8x1xf32>
    %cst_60 = arith.constant 3.200000e+01 : f32
    %125 = vector.broadcast %cst_60 : f32 to vector<8x1xf32>
    %126 = arith.divf %124, %125 : vector<8x1xf32>
    %127 = vector.broadcast %119 : vector<8x1xf32> to vector<8x32xf32>
    %128 = arith.subf %111, %127 : vector<8x32xf32>
    %cst_61 = arith.constant 9.99999974E-6 : f32
    %129 = vector.broadcast %cst_61 : f32 to vector<8x1xf32>
    %130 = arith.addf %126, %129 : vector<8x1xf32>
    %131 = math.rsqrt %130 : vector<8x1xf32>
    %132 = vector.broadcast %131 : vector<8x1xf32> to vector<8x32xf32>
    %133 = arith.mulf %128, %132 : vector<8x32xf32>
    %134 = vector.broadcast %113 : vector<1x32xf32> to vector<8x32xf32>
    %135 = arith.mulf %133, %134 : vector<8x32xf32>
    %136 = vector.broadcast %115 : vector<1x32xf32> to vector<8x32xf32>
    %137 = arith.addf %135, %136 : vector<8x32xf32>
    %138 = arith.truncf %137 : vector<8x32xf32> to vector<8x32xbf16>
    %c1 = arith.constant 1 : index
    %c0_62 = arith.constant 0 : index
    %c0_63 = arith.constant 0 : index
    %139 = vector.load %arg2[%c1, %c0_62, %c0_63] : memref<2x32x96xbf16, #tpu.memory_space<vmem>>, vector<1x32x96xbf16>
    %140 = vector.shape_cast %139 : vector<1x32x96xbf16> to vector<32x96xbf16>
    %cst_64 = arith.constant dense<0.000000e+00> : vector<8x96xf32>
    %141 = tpu.matmul %138, %140, %cst_64 {dimension_numbers = #tpu.dot_dimension_numbers<[1], [0], [0], [1], [0, 0, 1, 1], [], []>} : vector<8x32xbf16>, vector<32x96xbf16>, vector<8x96xf32> -> vector<8x96xf32>
    %c1_65 = arith.constant 1 : index
    %c0_66 = arith.constant 0 : index
    %c0_67 = arith.constant 0 : index
    %142 = vector.load %arg3[%c1_65, %c0_66, %c0_67] : memref<2x1x96xf32, #tpu.memory_space<vmem>>, vector<1x1x96xf32>
    %143 = vector.shape_cast %142 : vector<1x1x96xf32> to vector<1x96xf32>
    %144 = vector.broadcast %143 : vector<1x96xf32> to vector<8x96xf32>
    %145 = arith.addf %141, %144 : vector<8x96xf32>
    %146 = vector.extract_strided_slice %145 {offsets = [0, 0], sizes = [8, 32], strides = [1, 1]} : vector<8x96xf32> to vector<8x32xf32>
    %147 = vector.extract_strided_slice %145 {offsets = [0, 32], sizes = [8, 32], strides = [1, 1]} : vector<8x96xf32> to vector<8x32xf32>
    %148 = vector.extract_strided_slice %145 {offsets = [0, 64], sizes = [8, 32], strides = [1, 1]} : vector<8x96xf32> to vector<8x32xf32>
    %149 = vector.extract_strided_slice %146 {offsets = [0, 0], sizes = [8, 16], strides = [1, 1]} : vector<8x32xf32> to vector<8x16xf32>
    %150 = arith.truncf %149 : vector<8x16xf32> to vector<8x16xbf16>
    %151 = vector.extract_strided_slice %147 {offsets = [0, 0], sizes = [8, 16], strides = [1, 1]} : vector<8x32xf32> to vector<8x16xf32>
    %152 = arith.truncf %151 : vector<8x16xf32> to vector<8x16xbf16>
    %153 = vector.extract_strided_slice %148 {offsets = [0, 0], sizes = [8, 16], strides = [1, 1]} : vector<8x32xf32> to vector<8x16xf32>
    %154 = arith.truncf %153 : vector<8x16xf32> to vector<8x16xbf16>
    "tpu.trace_start"() <{level = 10 : i32, message = "qd,kd->qk"}> : () -> ()
    %cst_68 = arith.constant dense<0.000000e+00> : vector<8x8xf32>
    %155 = tpu.matmul %150, %152, %cst_68 {dimension_numbers = #tpu.dot_dimension_numbers<[1], [1], [0], [0], [0, 0, 1, 0], [], []>} : vector<8x16xbf16>, vector<8x16xbf16>, vector<8x8xf32> -> vector<8x8xf32>
    "tpu.trace_stop"() : () -> ()
    %156 = vector.broadcast %3 : f32 to vector<8x8xf32>
    %157 = arith.mulf %155, %156 : vector<8x8xf32>
    %cst_69 = arith.constant dense<0xFF800000> : vector<8xf32>
    %158 = vector.multi_reduction <maximumf>, %157, %cst_69 [1] : vector<8x8xf32> to vector<8xf32>
    %159 = vector.shape_cast %158 : vector<8xf32> to vector<8x1xf32>
    %160 = vector.broadcast %159 : vector<8x1xf32> to vector<8x8xf32>
    %161 = arith.subf %157, %160 : vector<8x8xf32>
    %162 = math.exp %161 : vector<8x8xf32>
    %cst_70 = arith.constant dense<0.000000e+00> : vector<8xf32>
    %163 = vector.multi_reduction <add>, %162, %cst_70 [1] : vector<8x8xf32> to vector<8xf32>
    %164 = vector.shape_cast %163 : vector<8xf32> to vector<8x1xf32>
    %165 = tpu.reciprocal %164 {approx = true} : vector<8x1xf32> -> vector<8x1xf32>
    %166 = vector.broadcast %165 : vector<8x1xf32> to vector<8x8xf32>
    %167 = arith.mulf %162, %166 : vector<8x8xf32>
    %168 = arith.truncf %167 : vector<8x8xf32> to vector<8x8xbf16>
    %cst_71 = arith.constant dense<0.000000e+00> : vector<8x16xf32>
    %169 = tpu.matmul %168, %154, %cst_71 {dimension_numbers = #tpu.dot_dimension_numbers<[1], [0], [0], [1], [0, 0, 1, 1], [], []>} : vector<8x8xbf16>, vector<8x16xbf16>, vector<8x16xf32> -> vector<8x16xf32>
    %170 = vector.extract_strided_slice %146 {offsets = [0, 16], sizes = [8, 16], strides = [1, 1]} : vector<8x32xf32> to vector<8x16xf32>
    %171 = arith.truncf %170 : vector<8x16xf32> to vector<8x16xbf16>
    %172 = vector.extract_strided_slice %147 {offsets = [0, 16], sizes = [8, 16], strides = [1, 1]} : vector<8x32xf32> to vector<8x16xf32>
    %173 = arith.truncf %172 : vector<8x16xf32> to vector<8x16xbf16>
    %174 = vector.extract_strided_slice %148 {offsets = [0, 16], sizes = [8, 16], strides = [1, 1]} : vector<8x32xf32> to vector<8x16xf32>
    %175 = arith.truncf %174 : vector<8x16xf32> to vector<8x16xbf16>
    "tpu.trace_start"() <{level = 10 : i32, message = "qd,kd->qk"}> : () -> ()
    %cst_72 = arith.constant dense<0.000000e+00> : vector<8x8xf32>
    %176 = tpu.matmul %171, %173, %cst_72 {dimension_numbers = #tpu.dot_dimension_numbers<[1], [1], [0], [0], [0, 0, 1, 0], [], []>} : vector<8x16xbf16>, vector<8x16xbf16>, vector<8x8xf32> -> vector<8x8xf32>
    "tpu.trace_stop"() : () -> ()
    %177 = vector.broadcast %3 : f32 to vector<8x8xf32>
    %178 = arith.mulf %176, %177 : vector<8x8xf32>
    %cst_73 = arith.constant dense<0xFF800000> : vector<8xf32>
    %179 = vector.multi_reduction <maximumf>, %178, %cst_73 [1] : vector<8x8xf32> to vector<8xf32>
    %180 = vector.shape_cast %179 : vector<8xf32> to vector<8x1xf32>
    %181 = vector.broadcast %180 : vector<8x1xf32> to vector<8x8xf32>
    %182 = arith.subf %178, %181 : vector<8x8xf32>
    %183 = math.exp %182 : vector<8x8xf32>
    %cst_74 = arith.constant dense<0.000000e+00> : vector<8xf32>
    %184 = vector.multi_reduction <add>, %183, %cst_74 [1] : vector<8x8xf32> to vector<8xf32>
    %185 = vector.shape_cast %184 : vector<8xf32> to vector<8x1xf32>
    %186 = tpu.reciprocal %185 {approx = true} : vector<8x1xf32> -> vector<8x1xf32>
    %187 = vector.broadcast %186 : vector<8x1xf32> to vector<8x8xf32>
    %188 = arith.mulf %183, %187 : vector<8x8xf32>
    %189 = arith.truncf %188 : vector<8x8xf32> to vector<8x8xbf16>
    %cst_75 = arith.constant dense<0.000000e+00> : vector<8x16xf32>
    %190 = tpu.matmul %189, %175, %cst_75 {dimension_numbers = #tpu.dot_dimension_numbers<[1], [0], [0], [1], [0, 0, 1, 1], [], []>} : vector<8x8xbf16>, vector<8x16xbf16>, vector<8x16xf32> -> vector<8x16xf32>
    %191 = tpu.concatenate %169, %190 in 1 : vector<8x16xf32>, vector<8x16xf32> -> vector<8x32xf32>
    %192 = arith.truncf %191 : vector<8x32xf32> to vector<8x32xbf16>
    %c1_76 = arith.constant 1 : index
    %c0_77 = arith.constant 0 : index
    %c0_78 = arith.constant 0 : index
    %193 = vector.load %arg4[%c1_76, %c0_77, %c0_78] : memref<2x32x32xbf16, #tpu.memory_space<vmem>>, vector<1x32x32xbf16>
    %194 = vector.shape_cast %193 : vector<1x32x32xbf16> to vector<32x32xbf16>
    %cst_79 = arith.constant dense<0.000000e+00> : vector<8x32xf32>
    %195 = tpu.matmul %192, %194, %cst_79 {dimension_numbers = #tpu.dot_dimension_numbers<[1], [0], [0], [1], [0, 0, 1, 1], [], []>} : vector<8x32xbf16>, vector<32x32xbf16>, vector<8x32xf32> -> vector<8x32xf32>
    %c1_80 = arith.constant 1 : index
    %c0_81 = arith.constant 0 : index
    %c0_82 = arith.constant 0 : index
    %196 = vector.load %arg5[%c1_80, %c0_81, %c0_82] : memref<2x1x32xf32, #tpu.memory_space<vmem>>, vector<1x1x32xf32>
    %197 = vector.shape_cast %196 : vector<1x1x32xf32> to vector<1x32xf32>
    %198 = vector.broadcast %197 : vector<1x32xf32> to vector<8x32xf32>
    %199 = arith.addf %195, %198 : vector<8x32xf32>
    %200 = arith.addf %137, %199 : vector<8x32xf32>
    %c1_83 = arith.constant 1 : index
    %c0_84 = arith.constant 0 : index
    %c0_85 = arith.constant 0 : index
    %201 = vector.load %arg6[%c1_83, %c0_84, %c0_85] : memref<2x1x32xf32, #tpu.memory_space<vmem>>, vector<1x1x32xf32>
    %202 = vector.shape_cast %201 : vector<1x1x32xf32> to vector<1x32xf32>
    %c1_86 = arith.constant 1 : index
    %c0_87 = arith.constant 0 : index
    %c0_88 = arith.constant 0 : index
    %203 = vector.load %arg7[%c1_86, %c0_87, %c0_88] : memref<2x1x32xf32, #tpu.memory_space<vmem>>, vector<1x1x32xf32>
    %204 = vector.shape_cast %203 : vector<1x1x32xf32> to vector<1x32xf32>
    %cst_89 = arith.constant dense<0.000000e+00> : vector<8xf32>
    %205 = vector.multi_reduction <add>, %200, %cst_89 [1] : vector<8x32xf32> to vector<8xf32>
    %206 = vector.shape_cast %205 : vector<8xf32> to vector<8x1xf32>
    %cst_90 = arith.constant 3.200000e+01 : f32
    %207 = vector.broadcast %cst_90 : f32 to vector<8x1xf32>
    %208 = arith.divf %206, %207 : vector<8x1xf32>
    %209 = vector.broadcast %208 : vector<8x1xf32> to vector<8x32xf32>
    %210 = arith.subf %200, %209 : vector<8x32xf32>
    %211 = arith.mulf %210, %210 : vector<8x32xf32>
    %cst_91 = arith.constant dense<0.000000e+00> : vector<8xf32>
    %212 = vector.multi_reduction <add>, %211, %cst_91 [1] : vector<8x32xf32> to vector<8xf32>
    %213 = vector.shape_cast %212 : vector<8xf32> to vector<8x1xf32>
    %cst_92 = arith.constant 3.200000e+01 : f32
    %214 = vector.broadcast %cst_92 : f32 to vector<8x1xf32>
    %215 = arith.divf %213, %214 : vector<8x1xf32>
    %216 = vector.broadcast %208 : vector<8x1xf32> to vector<8x32xf32>
    %217 = arith.subf %200, %216 : vector<8x32xf32>
    %cst_93 = arith.constant 9.99999974E-6 : f32
    %218 = vector.broadcast %cst_93 : f32 to vector<8x1xf32>
    %219 = arith.addf %215, %218 : vector<8x1xf32>
    %220 = math.rsqrt %219 : vector<8x1xf32>
    %221 = vector.broadcast %220 : vector<8x1xf32> to vector<8x32xf32>
    %222 = arith.mulf %217, %221 : vector<8x32xf32>
    %223 = vector.broadcast %202 : vector<1x32xf32> to vector<8x32xf32>
    %224 = arith.mulf %222, %223 : vector<8x32xf32>
    %225 = vector.broadcast %204 : vector<1x32xf32> to vector<8x32xf32>
    %226 = arith.addf %224, %225 : vector<8x32xf32>
    %227 = arith.truncf %226 : vector<8x32xf32> to vector<8x32xbf16>
    %c1_94 = arith.constant 1 : index
    %c0_95 = arith.constant 0 : index
    %c0_96 = arith.constant 0 : index
    %228 = vector.load %arg8[%c1_94, %c0_95, %c0_96] : memref<2x32x64xbf16, #tpu.memory_space<vmem>>, vector<1x32x64xbf16>
    %229 = vector.shape_cast %228 : vector<1x32x64xbf16> to vector<32x64xbf16>
    %cst_97 = arith.constant dense<0.000000e+00> : vector<8x64xf32>
    %230 = tpu.matmul %227, %229, %cst_97 {dimension_numbers = #tpu.dot_dimension_numbers<[1], [0], [0], [1], [0, 0, 1, 1], [], []>} : vector<8x32xbf16>, vector<32x64xbf16>, vector<8x64xf32> -> vector<8x64xf32>
    %c1_98 = arith.constant 1 : index
    %c0_99 = arith.constant 0 : index
    %c0_100 = arith.constant 0 : index
    %231 = vector.load %arg9[%c1_98, %c0_99, %c0_100] : memref<2x1x64xf32, #tpu.memory_space<vmem>>, vector<1x1x64xf32>
    %232 = vector.shape_cast %231 : vector<1x1x64xf32> to vector<1x64xf32>
    %233 = vector.broadcast %232 : vector<1x64xf32> to vector<8x64xf32>
    %234 = arith.addf %230, %233 : vector<8x64xf32>
    %cst_101 = arith.constant 0.000000e+00 : f32
    %235 = vector.broadcast %cst_101 : f32 to vector<8x64xf32>
    %236 = arith.maximumf %234, %235 : vector<8x64xf32>
    %237 = arith.truncf %236 : vector<8x64xf32> to vector<8x64xbf16>
    %c1_102 = arith.constant 1 : index
    %c0_103 = arith.constant 0 : index
    %c0_104 = arith.constant 0 : index
    %238 = vector.load %arg10[%c1_102, %c0_103, %c0_104] : memref<2x64x32xbf16, #tpu.memory_space<vmem>>, vector<1x64x32xbf16>
    %239 = vector.shape_cast %238 : vector<1x64x32xbf16> to vector<64x32xbf16>
    %cst_105 = arith.constant dense<0.000000e+00> : vector<8x32xf32>
    %240 = tpu.matmul %237, %239, %cst_105 {dimension_numbers = #tpu.dot_dimension_numbers<[1], [0], [0], [1], [0, 0, 1, 1], [], []>} : vector<8x64xbf16>, vector<64x32xbf16>, vector<8x32xf32> -> vector<8x32xf32>
    %c1_106 = arith.constant 1 : index
    %c0_107 = arith.constant 0 : index
    %c0_108 = arith.constant 0 : index
    %241 = vector.load %arg11[%c1_106, %c0_107, %c0_108] : memref<2x1x32xf32, #tpu.memory_space<vmem>>, vector<1x1x32xf32>
    %242 = vector.shape_cast %241 : vector<1x1x32xf32> to vector<1x32xf32>
    %243 = vector.broadcast %242 : vector<1x32xf32> to vector<8x32xf32>
    %244 = arith.addf %240, %243 : vector<8x32xf32>
    %245 = arith.addf %226, %244 : vector<8x32xf32>
    %c1_109 = arith.constant 1 : index
    %c0_110 = arith.constant 0 : index
    %c0_111 = arith.constant 0 : index
    %246 = vector.load %arg12[%c1_109, %c0_110, %c0_111] : memref<2x1x32xf32, #tpu.memory_space<vmem>>, vector<1x1x32xf32>
    %247 = vector.shape_cast %246 : vector<1x1x32xf32> to vector<1x32xf32>
    %c1_112 = arith.constant 1 : index
    %c0_113 = arith.constant 0 : index
    %c0_114 = arith.constant 0 : index
    %248 = vector.load %arg13[%c1_112, %c0_113, %c0_114] : memref<2x1x32xf32, #tpu.memory_space<vmem>>, vector<1x1x32xf32>
    %249 = vector.shape_cast %248 : vector<1x1x32xf32> to vector<1x32xf32>
    %cst_115 = arith.constant dense<0.000000e+00> : vector<8xf32>
    %250 = vector.multi_reduction <add>, %245, %cst_115 [1] : vector<8x32xf32> to vector<8xf32>
    %251 = vector.shape_cast %250 : vector<8xf32> to vector<8x1xf32>
    %cst_116 = arith.constant 3.200000e+01 : f32
    %252 = vector.broadcast %cst_116 : f32 to vector<8x1xf32>
    %253 = arith.divf %251, %252 : vector<8x1xf32>
    %254 = vector.broadcast %253 : vector<8x1xf32> to vector<8x32xf32>
    %255 = arith.subf %245, %254 : vector<8x32xf32>
    %256 = arith.mulf %255, %255 : vector<8x32xf32>
    %cst_117 = arith.constant dense<0.000000e+00> : vector<8xf32>
    %257 = vector.multi_reduction <add>, %256, %cst_117 [1] : vector<8x32xf32> to vector<8xf32>
    %258 = vector.shape_cast %257 : vector<8xf32> to vector<8x1xf32>
    %cst_118 = arith.constant 3.200000e+01 : f32
    %259 = vector.broadcast %cst_118 : f32 to vector<8x1xf32>
    %260 = arith.divf %258, %259 : vector<8x1xf32>
    %261 = vector.broadcast %253 : vector<8x1xf32> to vector<8x32xf32>
    %262 = arith.subf %245, %261 : vector<8x32xf32>
    %cst_119 = arith.constant 9.99999974E-6 : f32
    %263 = vector.broadcast %cst_119 : f32 to vector<8x1xf32>
    %264 = arith.addf %260, %263 : vector<8x1xf32>
    %265 = math.rsqrt %264 : vector<8x1xf32>
    %266 = vector.broadcast %265 : vector<8x1xf32> to vector<8x32xf32>
    %267 = arith.mulf %262, %266 : vector<8x32xf32>
    %268 = vector.broadcast %247 : vector<1x32xf32> to vector<8x32xf32>
    %269 = arith.mulf %267, %268 : vector<8x32xf32>
    %270 = vector.broadcast %249 : vector<1x32xf32> to vector<8x32xf32>
    %271 = arith.addf %269, %270 : vector<8x32xf32>
    %c0_120 = arith.constant 0 : index
    %c0_121 = arith.constant 0 : index
    %c0_122 = arith.constant 0 : index
    %272 = vector.load %arg14[%c0_120, %c0_121, %c0_122] : memref<1x8x32xf32, #tpu.memory_space<vmem>>, vector<1x8x32xf32>
    %273 = vector.shape_cast %272 : vector<1x8x32xf32> to vector<8x32xf32>
    %274 = vector.shape_cast %271 : vector<8x32xf32> to vector<1x8x32xf32>
    tpu.vector_store %arg14[%c0_120, %c0_121, %c0_122], %274 {strides = array<i32>} : memref<1x8x32xf32, #tpu.memory_space<vmem>>, vector<1x8x32xf32>,
    return
  }
  func.func @transform_0(%arg0: i32) -> (i32, i32, i32) {
    %c0_i32 = arith.constant 0 : i32
    %c0_i32_0 = arith.constant 0 : i32
    %c0_i32_1 = arith.constant 0 : i32
    return %arg0, %c0_i32, %c0_i32_0 : i32, i32, i32
  }
  func.func @transform_1(%arg0: i32) -> (i32, i32, i32) {
    %c0_i32 = arith.constant 0 : i32
    %c0_i32_0 = arith.constant 0 : i32
    %c0_i32_1 = arith.constant 0 : i32
    %c0_i32_2 = arith.constant 0 : i32
    return %c0_i32, %c0_i32_0, %c0_i32_1 : i32, i32, i32
  }
  func.func @transform_2(%arg0: i32) -> (i32, i32, i32) {
    %c0_i32 = arith.constant 0 : i32
    %c0_i32_0 = arith.constant 0 : i32
    %c0_i32_1 = arith.constant 0 : i32
    %c0_i32_2 = arith.constant 0 : i32
    return %c0_i32, %c0_i32_0, %c0_i32_1 : i32, i32, i32
  }
  func.func @transform_3(%arg0: i32) -> (i32, i32, i32) {
    %c0_i32 = arith.constant 0 : i32
    %c0_i32_0 = arith.constant 0 : i32
    %c0_i32_1 = arith.constant 0 : i32
    %c0_i32_2 = arith.constant 0 : i32
    return %c0_i32, %c0_i32_0, %c0_i32_1 : i32, i32, i32
  }
  func.func @transform_4(%arg0: i32) -> (i32, i32, i32) {
    %c0_i32 = arith.constant 0 : i32
    %c0_i32_0 = arith.constant 0 : i32
    %c0_i32_1 = arith.constant 0 : i32
    %c0_i32_2 = arith.constant 0 : i32
    return %c0_i32, %c0_i32_0, %c0_i32_1 : i32, i32, i32
  }
  func.func @transform_5(%arg0: i32) -> (i32, i32, i32) {
    %c0_i32 = arith.constant 0 : i32
    %c0_i32_0 = arith.constant 0 : i32
    %c0_i32_1 = arith.constant 0 : i32
    %c0_i32_2 = arith.constant 0 : i32
    return %c0_i32, %c0_i32_0, %c0_i32_1 : i32, i32, i32
  }
  func.func @transform_6(%arg0: i32) -> (i32, i32, i32) {
    %c0_i32 = arith.constant 0 : i32
    %c0_i32_0 = arith.constant 0 : i32
    %c0_i32_1 = arith.constant 0 : i32
    %c0_i32_2 = arith.constant 0 : i32
    return %c0_i32, %c0_i32_0, %c0_i32_1 : i32, i32, i32
  }
  func.func @transform_7(%arg0: i32) -> (i32, i32, i32) {
    %c0_i32 = arith.constant 0 : i32
    %c0_i32_0 = arith.constant 0 : i32
    %c0_i32_1 = arith.constant 0 : i32
    %c0_i32_2 = arith.constant 0 : i32
    return %c0_i32, %c0_i32_0, %c0_i32_1 : i32, i32, i32
  }
  func.func @transform_8(%arg0: i32) -> (i32, i32, i32) {
    %c0_i32 = arith.constant 0 : i32
    %c0_i32_0 = arith.constant 0 : i32
    %c0_i32_1 = arith.constant 0 : i32
    %c0_i32_2 = arith.constant 0 : i32
    return %c0_i32, %c0_i32_0, %c0_i32_1 : i32, i32, i32
  }
  func.func @transform_9(%arg0: i32) -> (i32, i32, i32) {
    %c0_i32 = arith.constant 0 : i32
    %c0_i32_0 = arith.constant 0 : i32
    %c0_i32_1 = arith.constant 0 : i32
    %c0_i32_2 = arith.constant 0 : i32
    return %c0_i32, %c0_i32_0, %c0_i32_1 : i32, i32, i32
  }
  func.func @transform_10(%arg0: i32) -> (i32, i32, i32) {
    %c0_i32 = arith.constant 0 : i32
    %c0_i32_0 = arith.constant 0 : i32
    %c0_i32_1 = arith.constant 0 : i32
    %c0_i32_2 = arith.constant 0 : i32
    return %c0_i32, %c0_i32_0, %c0_i32_1 : i32, i32, i32
  }
  func.func @transform_11(%arg0: i32) -> (i32, i32, i32) {
    %c0_i32 = arith.constant 0 : i32
    %c0_i32_0 = arith.constant 0 : i32
    %c0_i32_1 = arith.constant 0 : i32
    %c0_i32_2 = arith.constant 0 : i32
    return %c0_i32, %c0_i32_0, %c0_i32_1 : i32, i32, i32
  }
  func.func @transform_12(%arg0: i32) -> (i32, i32, i32) {
    %c0_i32 = arith.constant 0 : i32
    %c0_i32_0 = arith.constant 0 : i32
    %c0_i32_1 = arith.constant 0 : i32
    %c0_i32_2 = arith.constant 0 : i32
    return %c0_i32, %c0_i32_0, %c0_i32_1 : i32, i32, i32
  }
  func.func @transform_13(%arg0: i32) -> (i32, i32, i32) {
    %c0_i32 = arith.constant 0 : i32
    %c0_i32_0 = arith.constant 0 : i32
    %c0_i32_1 = arith.constant 0 : i32
    return %arg0, %c0_i32, %c0_i32_0 : i32, i32, i32
  }
}

</mosaic_0001>

<bundles_post_ra>
// kernel: tpu_custom_call.1
= control target key start
LH: loop header
LB: loop body
LE: loop exit
PB: predicated region body
PF: predicated region fallthrough
CT: control target
= control target key end

     0   :  { %s2240_s0 = inlined_call_operand.hbm [shape: f32[2,8,32], index: 0, kind: input, shape index: {}]   ;;  %s2241_s1 = inlined_call_operand.vmem [shape: bf16[2,32,96], index: 1, kind: input, shape index: {}]   ;;  %s2242_s2 = inlined_call_operand.hbm [shape: f32[2,1,96], index: 2, kind: input, shape index: {}]   ;;  %s2243_s3 = inlined_call_operand.vmem [shape: bf16[2,32,32], index: 3, kind: input, shape index: {}]   ;;  %s2244_s4 = inlined_call_operand.vmem [shape: f32[2,1,32], index: 4, kind: input, shape index: {}]   ;;  %s2245_s5 = inlined_call_operand.hbm [shape: f32[2,1,32], index: 5, kind: input, shape index: {}]   ;;  %s2246_s6 = inlined_call_operand.vmem [shape: f32[2,1,32], index: 6, kind: input, shape index: {}]   ;;  %s2247_s7 = inlined_call_operand.vmem [shape: bf16[2,32,64], index: 7, kind: input, shape index: {}]   ;;  %s2248_s8 = inlined_call_operand.vmem [shape: f32[2,1,64], index: 8, kind: input, shape index: {}]   ;;  %s2249_s9 = inlined_call_operand.vmem [shape: bf16[2,64,32], index: 9, kind: input, shape index: {}]   ;;  %s2250_s10 = inlined_call_operand.vmem [shape: f32[2,1,32], index: 10, kind: input, shape index: {}]   ;;  %s2251_s11 = inlined_call_operand.hbm [shape: f32[2,1,32], index: 11, kind: input, shape index: {}]   ;;  %s2252_s12 = inlined_call_operand.vmem [shape: f32[2,1,32], index: 12, kind: input, shape index: {}]   ;;  %s2253_s13 = inlined_call_operand.hbm [shape: f32[2,8,32], index: 13, kind: output, shape index: {}]  }
   0x1   :  { %2259 = sst [smem:[#allocation19_spill]] %s2242_s2 }
   0x2   :  { %2260 = sst [smem:[#allocation20_spill]] %s2245_s5 }
   0x3   :  { %2261 = sst [smem:[#allocation21_spill]] %s2251_s11 }
   0x4   :  { %18 = vsyncpa [#allocation3], 0 }
   0x5   :  { %20 = vsyncpa [#allocation3 + $0x1], 0 }
   0x6   :  { %21 = vsyncpa [#allocation6], 0 }
   0x7   :  { %22 = vsyncpa [#allocation9], 0 }
   0x8   :  { %23 = vsyncpa [#allocation4], 0 }
   0x9   :  { %25 = vsyncpa [#allocation4 + $0x1], 0  ;;  %s1915_s25 = smov 0   ;;  %s1917_s26 = smov 0  }
   0xa   :  { %s1919_s27 = smov 0   ;;  %s1921_s28 = smov 0  }
   0xb LB: > { %2262 = sst [smem:[#allocation15_spill]] %s1827_s27  ;;  %s1939_s15 = sadd.s32 4294967295, %s1831_s28   ;;  %s1831_s28 = sphi %s1921_s28, %s2278_s28   ;;  %s1827_s27 = sphi %s1919_s27, %s2280_s27   ;;  %s1823_s26 = sphi %s1917_s26, %s2282_s26   ;;  %s1819_s25 = sphi %s1915_s25, %s2281_s25  }
   0xc   : > { %s2263_s2 = sld [smem:[#allocation19_spill]]  ;;  %p1351_p0 = scmp.ge.s32.totalorder %s1831_s28, 1 }
   0xd   : > { %p52_p1 = scmp.eq.s32.totalorder %s1939_s15, 0  ;;  %p340_p2 = scmp.lt.s32.totalorder %s1831_s28, 3 }
   0xe   : > { %s1833_s17 = smov [#allocation5]   ;;  %s2265_s5 = sld [smem:[#allocation20_spill]] }
   0xf   : > { %p1944_p3 = pnand %p1351_p0, %p340_p2  ;;  %s356_s18 = sshll.u32 %s1833_s17, 4  ;;  %s357_s18 = int_to_ptr.vmem [resolvable:$true] %s356_s18 }
  0x10   : > { %s2267_s11 = sld [smem:[#allocation21_spill]]  ;;  %s1834_s30 = smov [#allocation7]  }
  0x11   : > { %p1525_p4 = pneg %p1944_p3  ;;  %s376_s17 = sshll.u32 %s1834_s30, 4  ;;  %s377_s17 = int_to_ptr.vmem [resolvable:$true] %s376_s17 }
  0x12   : > { %s354_s14 = sshll.u32 %s2263_s2, 4  ;;  %s1835_s19 = smov 16   ;;  %s355_s14 = int_to_ptr.hbm [resolvable:$true] %s354_s14 }
  0x13   : > { %p1956_p6 = pnand %p1525_p4, %p52_p1  ;;  %s1836_s20 = smov 1  }
  0x14   : > { %s374_s21 = sshll.u32 %s2265_s5, 4  ;;  %s1837_s23 = smov [#allocation8]   ;;  %s375_s21 = int_to_ptr.hbm [resolvable:$true] %s374_s21 }
  0x15   : > { %1528 = dma.hbm_to_vmem [thread:$0]  (!%p1956_p6), %s355_s14, 32, %s357_s18, [#allocation6], %s1835_s19, %s1835_s19, %s1836_s20  }
  0x16   : > { %s403_s29 = sshll.u32 %s2267_s11, 4  ;;  %s405_s24 = sshll.u32 %s1837_s23, 4  ;;  %s404_s29 = int_to_ptr.hbm [resolvable:$true] %s403_s29  ;;  %s406_s24 = int_to_ptr.vmem [resolvable:$true] %s405_s24 }
  0x17   : > { %1531 = dma.hbm_to_vmem [thread:$0]  (!%p1956_p6), %s375_s21, 32, %s377_s17, [#allocation6], %s1835_s19, %s1835_s19, %s1836_s20  }
  0x18   : > { %1534 = dma.hbm_to_vmem [thread:$0]  (!%p1956_p6), %s404_s29, 32, %s406_s24, [#allocation9], %s1835_s19, %s1835_s19, %s1836_s20  }
  0x19   : > { %s1350_s30 = sadd.s32 4294967294, %s1831_s28   ;;  %s1971_s2 = sadd.s32 1, %s1831_s28  }
  0x1a   : > { %2268 = sst [smem:[#allocation16_spill]] %s1971_s2  ;;  %s38_s5 = sadd.s32 1, %s1827_s27 }
  0x1b   : > { %s35_s14 = ssub.s32 %s1831_s28, %s1971_s2  ;;  %p45_p7 = scmp.ne.s32.totalorder %s1827_s27, %s1823_s26 }
  0x1c   : > { %p36_p8 = scmp.eq.s32.totalorder %s35_s14, 0  ;;  %p46_p9 = scmp.eq.s32.totalorder %s1831_s28, 0 }
  0x1d   : > { %p51_p10 = scmp.ne.s32.totalorder %s1823_s26, %s1819_s25  ;;  %p327_p11 = scmp.eq.s32.totalorder %s1939_s15, 1 }
  0x1e   : > { %s1983_s18 = scalar_select %p36_p8, %s1827_s27, %s38_s5  }
  0x1f   : > { %p1987_p12 = por %p52_p1, %p51_p10  ;;  %p1991_p13 = por %p327_p11, %p45_p7 }
  0x20   : > { %2269 = sst [smem:[#allocation17_spill]] %s1983_s18  ;;  %p333_p0 = scmp.eq.s32.totalorder %s1350_s30, 1 }
  0x21   : > { %p47_p2 = por %p46_p9, %p45_p7  ;;  %s422_s29 = sand.u32 1, %s1827_s27  }
  0x22   : > { %p1996_p4 = por %p333_p0, %p51_p10  ;;  %p1546_p6 = scmp.lt.s32.totalorder %s1831_s28, 2 }
  0x23   : > { %s1356_s19 = sshll.u32 %s422_s29, 3  ;;  %s1357_s5 = sshll.u32 %s1831_s28, 3 }
  0x24   : > { %s2272_s17 = scalar_select %p1996_p4, 1, 0 }
  0x25   : > { %s430_s24 = scalar_lea.hbm %s2240_s0, %s1357_s5  ;;  %s426_s11 = scalar_lea.vmem [#allocation2], %s1356_s19 }
  0x26   : > { %2273 = sst [smem:[#allocation18_spill]] %s2272_s17  ;;  %s432_s14 = sshll.u32 %s430_s24, 4  ;;  %s433_s14 = int_to_ptr.hbm [resolvable:$true] %s432_s14 }
  0x27   : > { %s434_s18 = sshll.u32 %s426_s11, 4  ;;  %p2005_p8 = pnand %p1546_p6, %p47_p2  ;;  %s435_s18 = int_to_ptr.vmem [resolvable:$true] %s434_s18 }
  0x28   : > { %s423_s27 = scalar_lea.sflag [#allocation3], %s422_s29  ;;  %s1727_s2 = sshra.s32 %s433_s14, 4  ;;  %s1728_s2 = int_to_ptr.hbm [resolvable:$true] %s1727_s2 }
  0x29   : > { %s1729_s17 = scalar_lea.hbm %s1728_s2, 8  ;;  %p1731_p9 = pneg %p2005_p8 }
  0x2a   : > { %p1730_p7 = scmp.ne.s32.totalorder %s1728_s2, %s1729_s17  ;;  %s1734_s11 = scalar_lea.hbm %s2240_s0, 16 }
  0x2b   : > { %p1735_p0 = scmp.lt.s32.totalorder %s1728_s2, %s2240_s0  ;;  %p1736_p2 = scmp.lt.s32.totalorder %s1734_s11, %s1729_s17 }
  0x2c   : > { %p1732_p10 = pnand %p1731_p9, %p1730_p7 }
  0x2d   : > { %p1737_p6 = por %p1736_p2, %p1735_p0 }
  0x2e   : > { %p1733_p11 = pneg %p1732_p10 }
  0x30   : > { %p1738_p5 = pnand %p1737_p6, %p1733_p11 }
  0x32   : > { %1741 = shalt.err (!%p1738_p5)
}
  0x33   : > { %1538 = dma.hbm_to_vmem [thread:$0]  (!%p2005_p8), %s433_s14, 128, %s435_s18, %s423_s27  }
  0x34   : > { %443 = sbr.rel (%p1944_p3) target bundleno = 3702 (0xe76), region = 72  ;;  %s2022_s29 = sand.u32 (!%p1944_p3), 1, %s1823_s26  }
  0x35   : > { %s2258_s24 = sshll.u32 (!%p1944_p3), %s2022_s29, 3  ;;  %s446_s5 = scalar_lea.sflag (!%p1944_p3), [#allocation3], %s2022_s29 }
  0x36   : > { %s449_s2 = scalar_lea.vmem (!%p1944_p3), [#allocation2], %s2258_s24 }
  0x39   : > { %1802 = dma.done.wait (%p1987_p12), %s446_s5, 128  }
  0x3a   : > { %1804 = vsyncadd (%p1987_p12), %s446_s5, 4294967168 }
  0x3b   : > { %1806 = dma.done.wait (%p52_p1), [#allocation6], 64  }
  0x3c   : > { %1808 = vsyncadd (%p52_p1), [#allocation6], 4294967232 }
  0x3d   : > { %1810 = dma.done.wait (%p52_p1), [#allocation9], 32  }
  0x3e   : > { %1812 = vsyncadd (%p52_p1), [#allocation9], 4294967264  ;;  %v1490_v0 = vld [vmem:[%s2241_s1 + $0x8] sm:$0xff]  ;;  %v1489_v1 = vld [vmem:[%s2241_s1] sm:$0xff]  ;;  %vm531_vm0 = vcmask 261120   ;;  %s1838_s21 = smov 112  }
  0x3f   : > { %v2046_v2 = vld [vmem:[%s449_s2] sm:$0xff]  ;;  %541 = vmatpush.bf16.msra.mxu0 %v1490_v0  ;;  %v1595_v4 = vld [vmem:[#allocation5] ss:$0 sm:$0xff]  ;;  %s1839_s14 = smov 96   ;;  %s1840_s30 = smov 80   ;;  %vm552_vm1 = vcmask 130048  }
  0x40   : > { %v510_v3 = vpack.c.bf16 %v2046_v2, %v2046_v2  ;;  %s1841_s20 = smov 64   ;;  %s1842_s11 = smov 48   ;;  %vm591_vm2 = vcmask 1043456   ;;  %vm573_vm3 = vcmask 64512   ;;  %v1492_v44 = vld [vmem:[%s2243_s3 + $0x8] sm:$0xff]  ;;  %v1491_v49 = vld [vmem:[%s2243_s3] sm:$0xff] }
  0x41   : > { %s1843_s5 = smov 16   ;;  %v1596_v53 = vld [vmem:[%s2244_s4] ss:$0 sm:$0xff]  ;;  %v1844_v59 = vmov 32.0   ;;  %vm822_vm8 = vcmask 523264   ;;  %s1486_s2 = sshll.u32 %s1939_s15, 3 }
  0x42   : > { %s1246_s18 = scalar_lea.hbm %s2253_s13, %s1486_s2  ;;  %s1236_s17 = scalar_lea.sflag [#allocation4], %s2022_s29 }
  0x43   : > { %542 = vmatpush.bf16.msra.mxu0 %v1489_v1  ;;  %s1250_s15 = sshll.u32 %s1246_s18, 4  ;;  %s1777_s2 = scalar_lea.hbm %s2253_s13, 16  ;;  %s1251_s15 = int_to_ptr.hbm [resolvable:$true] %s1250_s15 }
  0x46   : > { %1372 = vmatmul.msk.bf16.vlgmr.msra.gmra.mxu0 %vm531_vm0, %v510_v3 }
  0x47   : > { %700 = vmatpush.bf16.msrb.mxu0 %v1492_v44 }
  0x4b   : > { %701 = vmatpush.bf16.msrb.mxu0 %v1491_v49 }
  0xc3   : > { %v544_v5 = vpop.f32.mrf.mxu0 }
  0xc4   : > { %v545_v6 = vadd.f32 %v1595_v4, %v544_v5 }
  0xc6   : > { %v548_v7 = vpack.c.bf16 %v545_v6, %v545_v6 }
  0xc8   : > { %608 = vrot.lane.b32.xlu1 %v548_v7, %s1838_s21  ;;  %550 = vrot.lane.b32.xlu0 %v548_v7, %s1839_s14 }
  0xcb   : > { %v546_v8 = vpop.f32.mrf.mxu0 }
  0xcc   : > { %v1493_v8 = vld [vmem:[%s2247_s7] sm:$0xff] }
  0xd0   : > { %610 = vrot.lane.b32.xlu0 %v548_v7, %s1840_s30 }
  0xd8   : > { %586 = vrot.lane.b32.xlu0 %v548_v7, %s1841_s20 }
  0xe0   : > { %644 = vrot.lane.b32.xlu0 %v548_v7, %s1842_s11 }
 0x13a   : > { %v551_v9 = vpop.permute.xlu0 %550  ;;  %v609_v13 = vpop.permute.xlu1 %608 }
 0x13b   : > { %v557_v10 = vsel %vm552_vm1, %v551_v9, 0  ;;  %v1498_v9 = vld [vmem:[%s2249_s9 + $0x18] sm:$0xff] }
 0x13c   : > { %566 = vmatpush.bf16.xpose.msra.mxu1 %v557_v10 }
 0x142   : > { %v611_v11 = vpop.permute.xlu0 %610 }
 0x143   : > { %1373 = vmatmul.msk.bf16.vlgmr.msra.gmra.mxu1 %vm552_vm1, %v548_v7  ;;  %v616_v12 = vsel %vm552_vm1, %v611_v11, 0  ;;  %v1494_v7 = vld [vmem:[%s2247_s7 + $0x8] sm:$0xff] }
 0x144   : > { %625 = vmatpush.bf16.xpose.msra.mxu3 %v616_v12  ;;  %777 = vmatpush.bf16.msrb.mxu1 %v1494_v7  ;;  %v1497_v12 = vld [vmem:[%s2249_s9 + $0x10] sm:$0xff] }
 0x148   : > { %778 = vmatpush.bf16.msrb.mxu1 %v1493_v8 }
 0x14a   : > { %v587_v14 = vpop.permute.xlu0 %586 }
 0x14b   : > { %1375 = vmatmul.msk.bf16.vlgmr.msra.gmra.mxu3 %vm552_vm1, %v609_v13  ;;  %v593_v15 = vsel %vm591_vm2, %v587_v14, 0 }
 0x14c   : > { %602 = vmatpush.bf16.msra.mxu2 %v593_v15  ;;  %830 = vmatpush.bf16.msrb.mxu3 %v1498_v9 }
 0x150   : > { %831 = vmatpush.bf16.msrb.mxu3 %v1497_v12 }
 0x152   : > { %v645_v16 = vpop.permute.xlu0 %644 }
 0x153   : > { %v650_v17 = vsel %vm591_vm2, %v645_v16, 0 }
 0x154   : > { %659 = vmatpush.bf16.msrb.mxu2 %v650_v17 }
 0x1c0   : > { %v568_v18 = vpop.f32.mrf.mxu1 }
 0x1c1   : > { %v572_v19 = vmul.f32 0.25, %v568_v18 }
 0x1c3   : > { %v574_v20 = vsel %vm573_vm3, %v572_v19, -inf }
 0x1c4   : > { %575 = vmax.xlane.f32.xlu1 %v574_v20  ;;  %v1597_v20 = vld [vmem:[#allocation7] ss:$0 sm:$0xff] }
 0x1c8   : > { %v570_v21 = vpop.f32.mrf.mxu1 }
 0x1ce   : > { %v627_v22 = vpop.f32.mrf.mxu3 }
 0x1cf   : > { %v631_v23 = vmul.f32 0.25, %v627_v22 }
 0x1d1   : > { %v632_v24 = vsel %vm573_vm3, %v631_v23, -inf }
 0x1d2   : > { %633 = vmax.xlane.f32.xlu2 %v632_v24 }
 0x1d6   : > { %v629_v25 = vpop.f32.mrf.mxu3 }
 0x237   : > { %v576_v26 = vpop.xlane.xlu1 %575 }
 0x238   : > { %v577_v27 = vsub.f32 %v572_v19, %v576_v26 }
 0x23a   : > { %v578_v28 = vmul.f32 1.442695, %v577_v27  ;;  %v1496_v27 = vld [vmem:[%s2249_s9 + $0x8] sm:$0xff] }
 0x23b   : > { %832 = vmatpush.bf16.msrb.mxu3 %v1496_v27 }
 0x23c   : > { %1611 = vpow2.f32 %v578_v28  ;;  %v1495_v28 = vld [vmem:[%s2249_s9] sm:$0xff] }
 0x23f   : > { %833 = vmatpush.bf16.msrb.mxu3 %v1495_v28 }
 0x242   : > { %v1612_v29 = vpop.eup %1611 }
 0x243   : > { %v580_v30 = vsel %vm573_vm3, %v1612_v29, 0.0 }
 0x244   : > { %581 = vadd.xlane.f32.xlu2 %v580_v30 }
 0x245   : > { %v634_v31 = vpop.xlane.xlu2 %633 }
 0x246   : > { %v635_v32 = vsub.f32 %v631_v23, %v634_v31  ;;  %v1598_v23 = vld [vmem:[%s2246_s6] ss:$0 sm:$0xff] }
 0x248   : > { %v636_v33 = vmul.f32 1.442695, %v635_v32 }
 0x24a   : > { %1613 = vpow2.f32 %v636_v33 }
 0x250   : > { %v1614_v34 = vpop.eup %1613 }
 0x251   : > { %v638_v35 = vsel %vm573_vm3, %v1614_v34, 0.0 }
 0x252   : > { %639 = vadd.xlane.f32.xlu2 %v638_v35  ;;  %v1600_v35 = vld [vmem:[%s2250_s10] ss:$0 sm:$0xff] }
 0x2b7   : > { %v582_v36 = vpop.xlane.xlu2 %581 }
 0x2b8   : > { %1615 = vrcp.f32 %v582_v36 }
 0x2be   : > { %v1616_v37 = vpop.eup %1615 }
 0x2bf   : > { %v584_v38 = vmul.f32 %v1616_v37, %v1612_v29  ;;  %v1599_v29 = vld [vmem:[%s2248_s8] ss:$0 sm:$0xff] }
 0x2c1   : > { %v585_v39 = vpack.c.bf16 %v584_v38, %v584_v38 }
 0x2c3   : > { %1374 = vmatmul.msk.bf16.vlgmr.msra.gmra.mxu2 %vm573_vm3, %v585_v39 }
 0x2c5   : > { %v640_v40 = vpop.xlane.xlu2 %639 }
 0x2c6   : > { %1617 = vrcp.f32 %v640_v40 }
 0x2c7   : > { %1619 = vrcp.f32 %v1844_v59  ;;  %v1602_v59 = vld [vmem:[%s2252_s12] ss:$0 sm:$0xff] }
 0x2cc   : > { %v1618_v41 = vpop.eup %1617 }
 0x2cd   : > { %v642_v42 = vmul.f32 %v1618_v41, %v1614_v34  ;;  %v1620_v60 = vpop.eup %1619 }
 0x2ce   : > { %v714_v61 = vmul.f32 32.0, %v1620_v60  ;;  %vm718_vm4 = vweird.f32 %v1620_v60 }
 0x2cf   : > { %v643_v43 = vpack.c.bf16 %v642_v42, %v642_v42 }
 0x2d0   : > { %v715_v62 = vsub.f32 1.0, %v714_v61 }
 0x2d2   : > { %v716_v63 = vmul.f32 %v1620_v60, %v715_v62 }
 0x2d3   : > { %1376 = vmatmul.msk.bf16.vlgmr.msrb.gmra.mxu2 %vm573_vm3, %v643_v43 }
 0x2d4   : > { %v717_v0 = vadd.f32 %v1620_v60, %v716_v63 }
 0x2d6   : > { %v2082_v1 = vsel %vm718_vm4, %v1620_v60, %v717_v0  ;;  %v1603_v0 = vld [vmem:[#allocation5 + $0x1] ss:$0 sm:$0xff] }
 0x346   : > { %v604_v45 = vpop.f32.mrf.mxu2 }
 0x34e   : > { %v606_v46 = vpop.f32.mrf.mxu2 }
 0x34f   : > { %v1500_v46 = vld [vmem:[%s2241_s1 + $0x18] sm:$0xff] }
 0x350   : > { %904 = vmatpush.bf16.msra.mxu2 %v1500_v46  ;;  %v1501_v46 = vld [vmem:[%s2243_s3 + $0x10] sm:$0xff] }
 0x356   : > { %v661_v47 = vpop.f32.mrf.mxu2 }
 0x357   : > { %666 = vrot.lane.b32.xlu2 %v661_v47, %s1843_s5  ;;  %v1499_v47 = vld [vmem:[%s2241_s1 + $0x10] sm:$0xff] }
 0x358   : > { %905 = vmatpush.bf16.msra.mxu2 %v1499_v47 }
 0x35e   : > { %v663_v48 = vpop.f32.mrf.mxu2 }
 0x3b1   : > { %v667_v50 = vpop.permute.xlu2 %666 }
 0x3b2   : > { %v669_v51 = vsel %vm552_vm1, %v604_v45, %v667_v50 }
 0x3b3   : > { %v670_v52 = vpack.c.bf16 %v669_v51, %v669_v51 }
 0x3b5   : > { %1385 = vmatmul.msk.bf16.vlgmr.msrb.gmra.mxu0 %vm531_vm0, %v670_v52 }
 0x432   : > { %v703_v54 = vpop.f32.mrf.mxu0 }
 0x433   : > { %v704_v55 = vadd.f32 %v1596_v53, %v703_v54 }
 0x435   : > { %v707_v56 = vadd.f32 %v704_v55, %v2046_v2 }
 0x437   : > { %v710_v57 = vsel %vm531_vm0, %v707_v56, 0.0 }
 0x438   : > { %711 = vadd.xlane.f32.xlu0 %v710_v57  ;;  %v1601_v57 = vld [vmem:[#allocation8] ss:$0 sm:$0xff] }
 0x43a   : > { %v705_v58 = vpop.f32.mrf.mxu0 }
 0x4ab   : > { %v712_v3 = vpop.xlane.xlu0 %711 }
 0x4ac   : > { %v720_v4 = vmul.f32 %v2082_v1, %v712_v3 }
 0x4ae   : > { %v721_v5 = vsub.f32 %v707_v56, %v720_v4 }
 0x4b0   : > { %v722_v6 = vmul.f32 %v721_v5, %v721_v5 }
 0x4b2   : > { %v723_v2 = vsel %vm531_vm0, %v722_v6, 0.0 }
 0x4b3   : > { %724 = vadd.xlane.f32.xlu2 %v723_v2 }
 0x526   : > { %v725_v10 = vpop.xlane.xlu2 %724 }
 0x527   : > { %v726_v11 = vmul.f32 %v725_v10, %v2082_v1 }
 0x529   : > { %v727_v13 = vadd.f32 1e-05, %v726_v11 }
 0x52b   : > { %1621 = vrsqrt.f32 %v727_v13  ;;  %vm734_vm6 = vweird.f32 %v727_v13 }
 0x531   : > { %v1622_v14 = vpop.eup %1621 }
 0x532   : > { %v729_v15 = vmul.f32 %v1622_v14, %v727_v13  ;;  %vm735_vm5 = vweird.f32 %v1622_v14 }
 0x533   : > { %vm736_vm7 = vmor %vm734_vm6, %vm735_vm5 }
 0x534   : > { %v730_v16 = vmul.f32 %v1622_v14, %v729_v15 }
 0x536   : > { %v731_v17 = vmul.f32 0.5, %v730_v16 }
 0x538   : > { %v732_v18 = vsub.f32 1.5, %v731_v17 }
 0x53a   : > { %v733_v19 = vmul.f32 %v1622_v14, %v732_v18 }
 0x53c   : > { %v737_v21 = vsel %vm736_vm7, %v1622_v14, %v733_v19 }
 0x53d   : > { %v738_v22 = vmul.f32 %v737_v21, %v721_v5 }
 0x53f   : > { %v742_v24 = vmul.f32 %v1597_v20, %v738_v22 }
 0x541   : > { %v746_v25 = vadd.f32 %v1598_v23, %v742_v24 }
 0x543   : > { %v747_v26 = vpack.c.bf16 %v746_v25, %v746_v25 }
 0x545   : > { %1394 = vmatmul.msk.bf16.vlgmr.msrb.gmra.mxu1 %vm531_vm0, %v747_v26 }
 0x5c2   : > { %v780_v30 = vpop.f32.mrf.mxu1 }
 0x5c3   : > { %v781_v31 = vadd.f32 %v1599_v29, %v780_v30 }
 0x5c5   : > { %v784_v32 = vmax.f32 %v781_v31, 0.0 }
 0x5c7   : > { %v785_v33 = vpack.c.bf16 %v784_v32, %v784_v32 }
 0x5c9   : > { %1411 = vmatmul.msk.bf16.vlgmr.msrb.gmra.mxu3 %vm822_vm8, %v785_v33 }
 0x5ca   : > { %v782_v34 = vpop.f32.mrf.mxu1 }
 0x64c   : > { %v835_v36 = vpop.f32.mrf.mxu3 }
 0x64d   : > { %v836_v37 = vadd.f32 %v1600_v35, %v835_v36 }
 0x64f   : > { %v839_v38 = vadd.f32 %v836_v37, %v746_v25 }
 0x651   : > { %v842_v39 = vsel %vm531_vm0, %v839_v38, 0.0 }
 0x652   : > { %843 = vadd.xlane.f32.xlu1 %v842_v39 }
 0x654   : > { %v837_v40 = vpop.f32.mrf.mxu3 }
 0x6c5   : > { %v844_v41 = vpop.xlane.xlu1 %843 }
 0x6c6   : > { %v845_v42 = vmul.f32 %v844_v41, %v2082_v1 }
 0x6c8   : > { %v846_v43 = vsub.f32 %v839_v38, %v845_v42  ;;  %v1502_v42 = vld [vmem:[%s2243_s3 + $0x18] sm:$0xff] }
 0x6ca   : > { %v847_v44 = vmul.f32 %v846_v43, %v846_v43 }
 0x6cc   : > { %v848_v45 = vsel %vm531_vm0, %v847_v44, 0.0 }
 0x6cd   : > { %849 = vadd.xlane.f32.xlu1 %v848_v45 }
 0x740   : > { %v850_v48 = vpop.xlane.xlu1 %849 }
 0x741   : > { %v851_v49 = vmul.f32 %v850_v48, %v2082_v1 }
 0x743   : > { %v852_v50 = vadd.f32 1e-05, %v851_v49 }
 0x745   : > { %1623 = vrsqrt.f32 %v852_v50  ;;  %vm859_vm10 = vweird.f32 %v852_v50 }
 0x74b   : > { %v1624_v51 = vpop.eup %1623 }
 0x74c   : > { %v854_v52 = vmul.f32 %v1624_v51, %v852_v50  ;;  %vm860_vm9 = vweird.f32 %v1624_v51  ;;  %v1604_v50 = vld [vmem:[%s2244_s4 + $0x1] ss:$0 sm:$0xff] }
 0x74d   : > { %vm861_vm11 = vmor %vm859_vm10, %vm860_vm9 }
 0x74e   : > { %v855_v53 = vmul.f32 %v1624_v51, %v854_v52 }
 0x750   : > { %v856_v54 = vmul.f32 0.5, %v855_v53 }
 0x752   : > { %v857_v55 = vsub.f32 1.5, %v856_v54 }
 0x754   : > { %v858_v56 = vmul.f32 %v1624_v51, %v857_v55 }
 0x756   : > { %v862_v58 = vsel %vm861_vm11, %v1624_v51, %v858_v56 }
 0x757   : > { %v863_v60 = vmul.f32 %v862_v58, %v846_v43 }
 0x759   : > { %v867_v61 = vmul.f32 %v1601_v57, %v863_v60 }
 0x75b   : > { %v2129_v62 = vadd.f32 %v1602_v59, %v867_v61  ;;  %v1504_v61 = vld [vmem:[%s2247_s7 + $0x18] sm:$0xff] }
 0x75d   : > { %v872_v63 = vpack.c.bf16 %v2129_v62, %v2129_v62 }
 0x75f   : > { %1424 = vmatmul.msk.bf16.vlgmr.msra.gmra.mxu2 %vm531_vm0, %v872_v63  ;;  %v1508_v63 = vld [vmem:[%s2249_s9 + $0x38] sm:$0xff] }
 0x7e2   : > { %v907_v3 = vpop.f32.mrf.mxu2 }
 0x7e3   : > { %v908_v4 = vadd.f32 %v1603_v0, %v907_v3 }
 0x7e5   : > { %v911_v5 = vpack.c.bf16 %v908_v4, %v908_v4  ;;  %v1507_v4 = vld [vmem:[%s2249_s9 + $0x30] sm:$0xff] }
 0x7e7   : > { %913 = vrot.lane.b32.xlu2 %v911_v5, %s1839_s14  ;;  %968 = vrot.lane.b32.xlu0 %v911_v5, %s1838_s21 }
 0x7e8   : > { %970 = vrot.lane.b32.xlu1 %v911_v5, %s1840_s30  ;;  %s2275_s30 = sshll.u32 %s2022_s29, 3 }
 0x7ea   : > { %v909_v6 = vpop.f32.mrf.mxu2 }
 0x841   : > { %v914_v2 = vpop.permute.xlu2 %913 }
 0x842   : > { %v919_v7 = vsel %vm552_vm1, %v914_v2, 0 }
 0x843   : > { %928 = vmatpush.bf16.xpose.msra.mxu0 %v919_v7 }
 0x84a   : > { %1425 = vmatmul.msk.bf16.vlgmr.msra.gmra.mxu0 %vm552_vm1, %v911_v5 }
 0x84b   : > { %1062 = vmatpush.bf16.msrb.mxu0 %v1502_v42 }
 0x84f   : > { %1063 = vmatpush.bf16.msrb.mxu0 %v1501_v46  ;;  %v1609_v46 = vld [vmem:[#allocation8 + $0x1] ss:$0 sm:$0xff] }
 0x859   : > { %v969_v10 = vpop.permute.xlu0 %968 }
 0x85a   : > { %v971_v8 = vpop.permute.xlu1 %970 }
 0x85b   : > { %v976_v9 = vsel %vm552_vm1, %v971_v8, 0 }
 0x85c   : > { %985 = vmatpush.bf16.xpose.msra.mxu3 %v976_v9 }
 0x863   : > { %1427 = vmatmul.msk.bf16.vlgmr.msra.gmra.mxu3 %vm552_vm1, %v969_v10 }
 0x864   : > { %1190 = vmatpush.bf16.msrb.mxu3 %v1508_v63 }
 0x868   : > { %1191 = vmatpush.bf16.msrb.mxu3 %v1507_v4 }
 0x8c7   : > { %v930_v11 = vpop.f32.mrf.mxu0 }
 0x8c8   : > { %v934_v12 = vmul.f32 0.25, %v930_v11  ;;  %v1605_v11 = vld [vmem:[#allocation7 + $0x1] ss:$0 sm:$0xff] }
 0x8ca   : > { %v935_v13 = vsel %vm573_vm3, %v934_v12, -inf }
 0x8cb   : > { %936 = vmax.xlane.f32.xlu0 %v935_v13  ;;  %v1606_v13 = vld [vmem:[%s2246_s6 + $0x1] ss:$0 sm:$0xff] }
 0x8cf   : > { %v932_v14 = vpop.f32.mrf.mxu0 }
 0x8e6   : > { %v987_v15 = vpop.f32.mrf.mxu3 }
 0x8e7   : > { %v991_v16 = vmul.f32 0.25, %v987_v15 }
 0x8e9   : > { %v992_v17 = vsel %vm573_vm3, %v991_v16, -inf }
 0x8ea   : > { %993 = vmax.xlane.f32.xlu1 %v992_v17 }
 0x8ee   : > { %v989_v18 = vpop.f32.mrf.mxu3 }
 0x8ef   : > { %v1506_v18 = vld [vmem:[%s2249_s9 + $0x28] sm:$0xff] }
 0x8f0   : > { %1192 = vmatpush.bf16.msrb.mxu3 %v1506_v18 }
 0x903   : > { %1004 = vrot.lane.b32.xlu1 %v911_v5, %s1842_s11 }
 0x93e   : > { %v937_v19 = vpop.xlane.xlu0 %936 }
 0x93f   : > { %v938_v20 = vsub.f32 %v934_v12, %v937_v19  ;;  %v1505_v19 = vld [vmem:[%s2249_s9 + $0x20] sm:$0xff] }
 0x940   : > { %1193 = vmatpush.bf16.msrb.mxu3 %v1505_v19 }
 0x941   : > { %v939_v21 = vmul.f32 1.442695, %v938_v20  ;;  %v1607_v20 = vld [vmem:[%s2248_s8 + $0x1] ss:$0 sm:$0xff] }
 0x943   : > { %1625 = vpow2.f32 %v939_v21 }
 0x949   : > { %v1626_v22 = vpop.eup %1625 }
 0x94a   : > { %v941_v23 = vsel %vm573_vm3, %v1626_v22, 0.0 }
 0x94b   : > { %942 = vadd.xlane.f32.xlu0 %v941_v23 }
 0x95d   : > { %v994_v24 = vpop.xlane.xlu1 %993 }
 0x95e   : > { %v995_v25 = vsub.f32 %v991_v16, %v994_v24 }
 0x95f   : > { %947 = vrot.lane.b32.xlu0 %v911_v5, %s1841_s20  ;;  %s507_s20 = scalar_lea.vmem [#allocation10], %s2275_s30 }
 0x960   : > { %v996_v26 = vmul.f32 1.442695, %v995_v25  ;;  %s1248_s11 = sshll.u32 %s507_s20, 4  ;;  %s1249_s11 = int_to_ptr.vmem [resolvable:$true] %s1248_s11 }
 0x962   : > { %1627 = vpow2.f32 %v996_v26  ;;  %v1608_v26 = vld [vmem:[%s2250_s10 + $0x1] ss:$0 sm:$0xff] }
 0x968   : > { %v1628_v27 = vpop.eup %1627 }
 0x969   : > { %v998_v28 = vsel %vm573_vm3, %v1628_v27, 0.0 }
 0x96a   : > { %999 = vadd.xlane.f32.xlu2 %v998_v28 }
 0x975   : > { %v1005_v29 = vpop.permute.xlu1 %1004 }
 0x976   : > { %v1010_v30 = vsel %vm591_vm2, %v1005_v29, 0 }
 0x977   : > { %1019 = vmatpush.bf16.msrb.mxu2 %v1010_v30 }
 0x9be   : > { %v943_v31 = vpop.xlane.xlu0 %942 }
 0x9bf   : > { %1629 = vrcp.f32 %v943_v31 }
 0x9c5   : > { %v1630_v32 = vpop.eup %1629 }
 0x9c6   : > { %v945_v33 = vmul.f32 %v1630_v32, %v1626_v22 }
 0x9c8   : > { %v946_v36 = vpack.c.bf16 %v945_v33, %v945_v33 }
 0x9d1   : > { %v948_v34 = vpop.permute.xlu0 %947 }
 0x9d2   : > { %v953_v35 = vsel %vm591_vm2, %v948_v34, 0 }
 0x9d3   : > { %962 = vmatpush.bf16.msra.mxu1 %v953_v35 }
 0x9d6   : > { %1426 = vmatmul.msk.bf16.vlgmr.msra.gmra.mxu1 %vm573_vm3, %v946_v36 }
 0x9d7   : > { %1136 = vmatpush.bf16.msrb.mxu1 %v1504_v61 }
 0x9dd   : > { %v1000_v37 = vpop.xlane.xlu2 %999 }
 0x9de   : > { %1631 = vrcp.f32 %v1000_v37 }
 0x9e4   : > { %v1632_v38 = vpop.eup %1631 }
 0x9e5   : > { %v1002_v39 = vmul.f32 %v1632_v38, %v1628_v27 }
 0x9e7   : > { %v1003_v40 = vpack.c.bf16 %v1002_v39, %v1002_v39 }
 0x9e9   : > { %1428 = vmatmul.msk.bf16.vlgmr.msrb.gmra.mxu2 %vm573_vm3, %v1003_v40 }
 0xa53   : > { %v964_v41 = vpop.f32.mrf.mxu1 }
 0xa5b   : > { %v966_v43 = vpop.f32.mrf.mxu1 }
 0xa6c   : > { %v1021_v44 = vpop.f32.mrf.mxu2 }
 0xa6d   : > { %1026 = vrot.lane.b32.xlu2 %v1021_v44, %s1843_s5  ;;  %s1771_s5 = sshra.s32 %s1251_s15, 4  ;;  %s1772_s5 = int_to_ptr.hbm [resolvable:$true] %s1771_s5 }
 0xa6e   : > { %s1773_s19 = scalar_lea.hbm %s1772_s5, 8  ;;  %p1778_p12 = scmp.lt.s32.totalorder %s1772_s5, %s2253_s13 }
 0xa6f   : > { %p1774_p1 = scmp.ne.s32.totalorder %s1772_s5, %s1773_s19  ;;  %p1779_p8 = scmp.lt.s32.totalorder %s1777_s2, %s1773_s19 }
 0xa71   : > { %p1775_p3 = pnand %p1774_p1, %p1991_p13  ;;  %p1780_p7 = por %p1779_p8, %p1778_p12 }
 0xa73   : > { %p1776_p5 = pneg %p1775_p3 }
 0xa74   : > { %v1023_v45 = vpop.f32.mrf.mxu2 }
 0xa75   : > { %p1781_p9 = pnand %p1780_p7, %p1776_p5 }
 0xac7   : > { %v1027_v47 = vpop.permute.xlu2 %1026 }
 0xac8   : > { %v1029_v48 = vsel %vm552_vm1, %v964_v41, %v1027_v47 }
 0xac9   : > { %v1030_v49 = vpack.c.bf16 %v1029_v48, %v1029_v48  ;;  %v1610_v48 = vld [vmem:[%s2252_s12 + $0x1] ss:$0 sm:$0xff] }
 0xacb   : > { %1442 = vmatmul.msk.bf16.vlgmr.msrb.gmra.mxu0 %vm531_vm0, %v1030_v49 }
 0xb48   : > { %v1065_v51 = vpop.f32.mrf.mxu0 }
 0xb49   : > { %v1066_v52 = vadd.f32 %v1604_v50, %v1065_v51 }
 0xb4b   : > { %v1069_v53 = vadd.f32 %v1066_v52, %v2129_v62  ;;  %v1503_v62 = vld [vmem:[%s2247_s7 + $0x10] sm:$0xff] }
 0xb4c   : > { %1137 = vmatpush.bf16.msrb.mxu1 %v1503_v62 }
 0xb4d   : > { %v1074_v54 = vsel %vm531_vm0, %v1069_v53, 0.0 }
 0xb4e   : > { %1075 = vadd.xlane.f32.xlu1 %v1074_v54 }
 0xb50   : > { %v1067_v55 = vpop.f32.mrf.mxu0 }
 0xbc1   : > { %v1076_v56 = vpop.xlane.xlu1 %1075 }
 0xbc2   : > { %v1077_v57 = vmul.f32 %v1076_v56, %v2082_v1 }
 0xbc4   : > { %v1078_v58 = vsub.f32 %v1069_v53, %v1077_v57 }
 0xbc6   : > { %v1079_v59 = vmul.f32 %v1078_v58, %v1078_v58 }
 0xbc8   : > { %v1080_v60 = vsel %vm531_vm0, %v1079_v59, 0.0 }
 0xbc9   : > { %1081 = vadd.xlane.f32.xlu0 %v1080_v60 }
 0xc3c   : > { %v1082_v0 = vpop.xlane.xlu0 %1081 }
 0xc3d   : > { %v1083_v3 = vmul.f32 %v1082_v0, %v2082_v1 }
 0xc3f   : > { %v1084_v5 = vadd.f32 1e-05, %v1083_v3 }
 0xc41   : > { %1633 = vrsqrt.f32 %v1084_v5  ;;  %vm1091_vm13 = vweird.f32 %v1084_v5 }
 0xc47   : > { %v1634_v6 = vpop.eup %1633 }
 0xc48   : > { %v1086_v2 = vmul.f32 %v1634_v6, %v1084_v5  ;;  %vm1092_vm12 = vweird.f32 %v1634_v6 }
 0xc49   : > { %vm1093_vm14 = vmor %vm1091_vm13, %vm1092_vm12 }
 0xc4a   : > { %v1087_v7 = vmul.f32 %v1634_v6, %v1086_v2 }
 0xc4c   : > { %v1088_v8 = vmul.f32 0.5, %v1087_v7 }
 0xc4e   : > { %v1089_v9 = vsub.f32 1.5, %v1088_v8 }
 0xc50   : > { %v1090_v10 = vmul.f32 %v1634_v6, %v1089_v9 }
 0xc52   : > { %v1094_v12 = vsel %vm1093_vm14, %v1634_v6, %v1090_v10 }
 0xc53   : > { %v1095_v14 = vmul.f32 %v1094_v12, %v1078_v58 }
 0xc55   : > { %v1099_v15 = vmul.f32 %v1605_v11, %v1095_v14 }
 0xc57   : > { %v1103_v16 = vadd.f32 %v1606_v13, %v1099_v15 }
 0xc59   : > { %v1104_v17 = vpack.c.bf16 %v1103_v16, %v1103_v16 }
 0xc5b   : > { %1457 = vmatmul.msk.bf16.vlgmr.msrb.gmra.mxu1 %vm531_vm0, %v1104_v17 }
 0xcd8   : > { %v1139_v21 = vpop.f32.mrf.mxu1 }
 0xcd9   : > { %v1140_v22 = vadd.f32 %v1607_v20, %v1139_v21 }
 0xcdb   : > { %v1143_v23 = vmax.f32 %v1140_v22, 0.0 }
 0xcdd   : > { %v1144_v24 = vpack.c.bf16 %v1143_v23, %v1143_v23 }
 0xcdf   : > { %1483 = vmatmul.msk.bf16.vlgmr.msrb.gmra.mxu3 %vm822_vm8, %v1144_v24 }
 0xce0   : > { %v1141_v25 = vpop.f32.mrf.mxu1 }
 0xd62   : > { %v1195_v27 = vpop.f32.mrf.mxu3 }
 0xd63   : > { %v1196_v28 = vadd.f32 %v1608_v26, %v1195_v27 }
 0xd65   : > { %v1199_v29 = vadd.f32 %v1196_v28, %v1103_v16 }
 0xd67   : > { %v1204_v30 = vsel %vm531_vm0, %v1199_v29, 0.0 }
 0xd68   : > { %1205 = vadd.xlane.f32.xlu2 %v1204_v30 }
 0xd6a   : > { %v1197_v31 = vpop.f32.mrf.mxu3 }
 0xddb   : > { %v1206_v32 = vpop.xlane.xlu2 %1205 }
 0xddc   : > { %v1207_v33 = vmul.f32 %v1206_v32, %v2082_v1 }
 0xdde   : > { %v1208_v34 = vsub.f32 %v1199_v29, %v1207_v33 }
 0xde0   : > { %v1209_v35 = vmul.f32 %v1208_v34, %v1208_v34 }
 0xde2   : > { %v1210_v36 = vsel %vm531_vm0, %v1209_v35, 0.0 }
 0xde3   : > { %1211 = vadd.xlane.f32.xlu1 %v1210_v36 }
 0xe56   : > { %v1212_v37 = vpop.xlane.xlu1 %1211 }
 0xe57   : > { %v1213_v38 = vmul.f32 %v1212_v37, %v2082_v1 }
 0xe59   : > { %v1214_v39 = vadd.f32 1e-05, %v1213_v38 }
 0xe5b   : > { %1635 = vrsqrt.f32 %v1214_v39  ;;  %vm1221_vm1 = vweird.f32 %v1214_v39 }
 0xe61   : > { %v1636_v40 = vpop.eup %1635 }
 0xe62   : > { %v1216_v41 = vmul.f32 %v1636_v40, %v1214_v39  ;;  %vm1222_vm15 = vweird.f32 %v1636_v40 }
 0xe63   : > { %vm1223_vm2 = vmor %vm1221_vm1, %vm1222_vm15 }
 0xe64   : > { %v1217_v42 = vmul.f32 %v1636_v40, %v1216_v41 }
 0xe66   : > { %v1218_v43 = vmul.f32 0.5, %v1217_v42 }
 0xe68   : > { %v1219_v44 = vsub.f32 1.5, %v1218_v43 }
 0xe6a   : > { %v1220_v45 = vmul.f32 %v1636_v40, %v1219_v44 }
 0xe6c   : > { %v1224_v1 = vsel %vm1223_vm2, %v1636_v40, %v1220_v45 }
 0xe6d   : > { %v1225_v47 = vmul.f32 %v1224_v1, %v1208_v34 }
 0xe6f   : > { %v1229_v49 = vmul.f32 %v1609_v46, %v1225_v47 }
 0xe71   : > { %v1233_v50 = vadd.f32 %v1610_v48, %v1229_v49 }
 0xe73   : > { %1234 = vst.msk [vmem:[%s507_s20] sm:$0xff] %vm531_vm0, %v1233_v50 }
 0xe74   : > { %1784 = shalt.err (!%p1781_p9)
}
 0xe75   : > { %1523 = dma.vmem_to_hbm [thread:$0]  (%p1991_p13), %s1249_s11, 128, %s1251_s15, %s1236_s17  }
 0xe76 PF: > { %s1262_s18 = sand.u32 1, %s1819_s25   ;;  %p2277_p10 = scmp.ge.s32.totalorder %s1831_s28, 2 }
 0xe77   : > { %s1263_s21 = scalar_lea.sflag [#allocation4], %s1262_s18 }
 0xe78   : > { %p1540_p11 = pnand %p2277_p10, %p1996_p4 }
 0xe7a   : > { %p1541_p0 = pneg %p1540_p11 }
 0xe7c   : > { %1814 = dma.done.wait (%p1541_p0), %s1263_s21, 128  }
 0xe7d   : > { %1816 = vsyncadd (%p1541_p0), %s1263_s21, 4294967168  ;;  %s2278_s28 = sld [smem:[#allocation16_spill]]  ;;  %s2281_s25 = smov %s1823_s26 }
 0xe7e   : > { %s2279_s14 = sld [smem:[#allocation15_spill]] }
 0xe7f   : > { %s2280_s27 = sld [smem:[#allocation17_spill]] }
 0xe83   : > { %p28_p2 = scmp.ge.s32.totalorder %s2278_s28, 4  }
 0xe84   : > { %s2282_s26 = smov %s2279_s14 }
 0xe85   :  { %30 = sbr.rel (!%p28_p2) target bundleno = 11 (0xb), region = 141 }
 0xe8a   :  { %1269 = vsyncpa [#allocation3], 1 }
 0xe8b   :  { %1271 = vsyncpa [#allocation3 + $0x1], 1 }
 0xe8c   :  { %1272 = vsyncpa [#allocation6], 1 }
 0xe8d   :  { %1273 = vsyncpa [#allocation9], 1 }
 0xe8e   :  { %1274 = vsyncpa [#allocation4], 1 }
 0xe8f   :  { %1276 = vsyncpa [#allocation4 + $0x1], 1 }

</bundles_post_ra>
